<compile_context>
chip_gen: v5e
topology: v5e:2x2
jax: 0.10.0
libtpu: 0.0.40
codegen_flags: <defaults>
</compile_context>

<pallas_src>
import functools

import numpy as np
import jax
import jax.numpy as jnp
from jax.experimental import pallas as pl
from jax.experimental.pallas import tpu as pltpu


# ---------------------------------------------------------------------------
# Fused kernel
# ---------------------------------------------------------------------------
def _deep1dcnn_kernel(x_ref, w1_ref, b1_ref, w2_ref, b2_ref, w3_hbm, b3_ref,
                      s1_ref, s2_ref, s3_ref, fw1_hbm, fb1_ref, fw2_hbm,
                      fb2_ref, o_ref, w3_buf, fw1_buf, fw2_buf, sem):
    f32 = jnp.float32

    # ---- Kick off the stage-3 / FC-head weight DMAs immediately (review #2).
    # These ~0.4 MiB of bf16 weights are NOT part of the gridless prologue DMA;
    # they stream in behind stage-1/2 compute and are waited on just-in-time.
    cp_w3 = pltpu.make_async_copy(w3_hbm, w3_buf, sem.at[0])
    cp_fw1 = pltpu.make_async_copy(fw1_hbm, fw1_buf, sem.at[1])
    cp_fw2 = pltpu.make_async_copy(fw2_hbm, fw2_buf, sem.at[2])
    cp_w3.start()
    cp_fw1.start()
    cp_fw2.start()

    def maxpool2(y, sel):
        """MaxPool1d(2): adjacent max, then an exact 0/1 selection matmul that
        compacts the pooled rows and drops cross-batch garbage rows."""
        adj = jnp.maximum(y[:-1, :], y[1:, :])
        return jnp.dot(sel, adj, preferred_element_type=f32)

    def conv3_wide(h, w_wide, b, cout):
        """Valid Conv1d(k=3) + folded-BN bias + ReLU as ONE MXU dot (review #3):
        the 3 taps are packed side-by-side along the output lanes (N = 3*cout);
        the shifted, cout-aligned lane blocks are summed on the VPU."""
        n = h.shape[0] - 2
        yw = jnp.dot(h, w_wide, preferred_element_type=f32)      # (rows, 3*cout)
        y = (yw[0:n, 0:cout]
             + yw[1:n + 1, cout:2 * cout]
             + yw[2:n + 2, 2 * cout:3 * cout])
        return jnp.maximum(y + b, 0.0)

    # ---- Stage 1: Conv1d(1->64)+BN+ReLU+pool.  The (rows, 3) im2col slab is
    # ---- built in the wrapper, so the conv is one small-K MXU dot (review #7).
    y = jnp.maximum(jnp.dot(x_ref[...], w1_ref[...],
                            preferred_element_type=f32) + b1_ref[...], 0.0)
    h = maxpool2(y, s1_ref[...])                                 # (B*L1, 64)

    # ---- Stage 2: Conv1d(64->128)+BN+ReLU+pool.  bf16 weights are de-quantized
    # ---- on the VPU (review #1) so the matmul accuracy stays f32.
    y = conv3_wide(h, w2_ref[...].astype(f32), b2_ref[...], 128)
    h = maxpool2(y, s2_ref[...])                                 # (B*L2, 128)

    # ---- Stage 3: Conv1d(128->256)+BN+ReLU.  Wait on its weight DMA only now.
    cp_w3.wait()
    y = conv3_wide(h, w3_buf[...].astype(f32), b3_ref[...], 256) # (B*L2-2, 256)
    adj3 = jnp.maximum(y[:-1, :], y[1:, :])

    # ---- FC head (review #4).  Stage-3 pooling, the PyTorch channel-major
    # ---- flatten and fc1 are fused: s3[l] compacts pooled position l of every
    # ---- batch element, the lane-aligned concat builds the (B, L3*256) fc1
    # ---- input, and fw1 was permuted offline to match -> ONE deep-K matmul.
    n_pos = s3_ref.shape[0]
    h3 = jnp.concatenate(
        [jnp.dot(s3_ref[l], adj3, preferred_element_type=f32)
         for l in range(n_pos)], axis=1)                         # (B, L3*256)
    cp_fw1.wait()
    hfc = jnp.maximum(jnp.dot(h3, fw1_buf[...].astype(f32),
                              preferred_element_type=f32) + fb1_ref[...], 0.0)

    # fc2 is zero-padded to 128 output lanes -> the only HBM store is
    # lane-dense; logits are sliced back outside the kernel.
    cp_fw2.wait()
    o_ref[...] = jnp.dot(hfc, fw2_buf[...].astype(f32),
                         preferred_element_type=f32) + fb2_ref[...]


# ---------------------------------------------------------------------------
# Wrapper
# ---------------------------------------------------------------------------
def deep1dcnn_forward(x_ncl, params, num_classes):
    """x_ncl: (B, 1, L) float32 (PyTorch Conv1d layout) -> (B, num_classes)."""
    B, _, L = x_ncl.shape
    p = params
    n1 = B * L - 2
    x_col = x_ncl.reshape(B * L, 1)
    # Stage-1 im2col (rows, 3) built outside the kernel: ~1 KB of extra DMA,
    # turns stage 1 into a single MXU dot with no in-kernel lane broadcast.
    x_slab = jnp.concatenate([x_col[0:n1], x_col[1:n1 + 1], x_col[2:n1 + 2]],
                             axis=1)

    n_cls_pad = p["fw2"].shape[1]
    vmem = pl.BlockSpec(memory_space=pltpu.MemorySpace.VMEM)
    hbm = pl.BlockSpec(memory_space=pl.ANY)     # late weights: manual async DMA

    args = (x_slab, p["w1"], p["b1"], p["w2"], p["b2"], p["w3"], p["b3"],
            p["s1"], p["s2"], p["s3"], p["fw1"], p["fb1"], p["fw2"], p["fb2"])
    in_specs = [vmem, vmem, vmem, vmem, vmem, hbm, vmem,
                vmem, vmem, vmem, hbm, vmem, hbm, vmem]

    # Advisory cost hint (review #8) so XLA schedules around this tiny call.
    flops = 2 * (x_slab.shape[0] * 3 * 64
                 + p["s1"].shape[0] * p["s1"].shape[1] * 64
                 + p["s1"].shape[0] * 64 * p["w2"].shape[1]
                 + p["s2"].shape[0] * p["s2"].shape[1] * 128
                 + p["s2"].shape[0] * 128 * p["w3"].shape[1]
                 + p["s3"].shape[0] * B * p["s3"].shape[2] * 256
                 + B * p["fw1"].shape[0] * 128
                 + B * 128 * n_cls_pad)
    bytes_accessed = int(sum(int(np.prod(a.shape)) * a.dtype.itemsize
                             for a in args) + B * n_cls_pad * 4)

    # NOTE: total VMEM use is well under 2 MiB, so no vmem_limit_bytes / grid
    # tiling is needed; add a batch-block grid before scaling B (see header).
    logits_pad = pl.pallas_call(
        _deep1dcnn_kernel,
        out_shape=jax.ShapeDtypeStruct((B, n_cls_pad), jnp.float32),
        in_specs=in_specs,
        out_specs=vmem,
        scratch_shapes=[
            pltpu.VMEM(p["w3"].shape, jnp.bfloat16),
            pltpu.VMEM(p["fw1"].shape, jnp.bfloat16),
            pltpu.VMEM(p["fw2"].shape, jnp.bfloat16),
            pltpu.SemaphoreType.DMA((3,)),
        ],
        cost_estimate=pl.CostEstimate(flops=int(flops), transcendentals=0,
                                      bytes_accessed=bytes_accessed),
    )(*args)
    return logits_pad[:, :num_classes]


# ---------------------------------------------------------------------------
# Parameters: folded / repacked / bf16-quantized kernel params + f32 reference
# ---------------------------------------------------------------------------
def make_params(input_size, num_classes, batch, key):
    f32, bf16 = jnp.float32, jnp.bfloat16

    def bn_fold(c):
        # PyTorch-default BatchNorm1d eval stats: gamma=1, beta=0, mean=0, var=1.
        gamma = jnp.ones((1, c), f32)
        beta = jnp.zeros((1, c), f32)
        rmean = jnp.zeros((1, c), f32)
        rvar = jnp.ones((1, c), f32)
        scale = gamma * jax.lax.rsqrt(rvar + 1e-5)
        shift = beta - rmean * scale
        return scale, shift

    L1 = (input_size - 2) // 2
    L2 = (L1 - 2) // 2
    L3 = (L2 - 2) // 2
    flat = 256 * L3
    # TODO(synk): original fc1 in_features formula 256*((input_size-6)//8) is
    # inconsistent with the conv/pool chain; fc1 is sized from the actual count.

    keys = jax.random.split(key, 10)
    w1 = 0.1 * jax.random.normal(keys[0], (3, 1, 64), f32)
    b1 = 0.1 * jax.random.normal(keys[1], (1, 64), f32)
    sc1, t1 = bn_fold(64)
    w2 = 0.05 * jax.random.normal(keys[2], (3, 64, 128), f32)
    b2 = 0.1 * jax.random.normal(keys[3], (1, 128), f32)
    sc2, t2 = bn_fold(128)
    w3 = 0.05 * jax.random.normal(keys[4], (3, 128, 256), f32)
    b3 = 0.1 * jax.random.normal(keys[5], (1, 256), f32)
    sc3, t3 = bn_fold(256)
    fw1 = 0.05 * jax.random.normal(keys[6], (flat, 128), f32)  # rows: c*L3+l (PyTorch)
    fb1 = 0.1 * jax.random.normal(keys[7], (1, 128), f32)
    fw2 = 0.05 * jax.random.normal(keys[8], (128, num_classes), f32)
    fb2 = 0.1 * jax.random.normal(keys[9], (1, num_classes), f32)

    # BatchNorm folded exactly into conv w/b (f32); big operands then quantized
    # ONCE to bf16 (review #1).  The reference consumes the same de-quantized
    # values so the numeric check validates kernel arithmetic tightly.
    w1f = w1 * sc1
    b1f = b1 * sc1 + t1
    w2q = (w2 * sc2).astype(bf16)
    b2f = b2 * sc2 + t2
    w3q = (w3 * sc3).astype(bf16)
    b3f = b3 * sc3 + t3
    fw1q = fw1.astype(bf16)
    fw2q = fw2.astype(bf16)

    # 0/1 selection matrix: "pool adjacent pairs + compact + drop cross-batch rows".
    def pool_select(seg_in, seg_out):
        sel = np.zeros((batch * seg_out, batch * seg_in - 3), np.float32)
        for b in range(batch):
            for i in range(seg_out):
                sel[b * seg_out + i, b * seg_in + 2 * i] = 1.0
        return sel

    kp = {}
    kp["w1"] = w1f.reshape(3, 64)                                   # (K, 64) f32
    kp["b1"] = b1f
    # Taps merged along the OUTPUT-lane dim (wide-N): one MXU dot per stage.
    kp["w2"] = jnp.transpose(w2q, (1, 0, 2)).reshape(64, 3 * 128)   # bf16
    kp["b2"] = b2f
    kp["w3"] = jnp.transpose(w3q, (1, 0, 2)).reshape(128, 3 * 256)  # bf16, async DMA
    kp["b3"] = b3f
    kp["s1"] = jnp.asarray(pool_select(input_size, L1))
    kp["s2"] = jnp.asarray(pool_select(L1, L2))
    s3 = pool_select(L2, L3).reshape(batch, L3, batch * L2 - 3)
    kp["s3"] = jnp.asarray(np.transpose(s3, (1, 0, 2)))             # (L3, B, cols)
    # fc1 rows permuted from PyTorch channel-major order (c*L3+l) into
    # per-position blocks (l*256+c) matching the kernel's NLC concat; bf16.
    kp["fw1"] = jnp.transpose(fw1q.reshape(256, L3, 128),
                              (1, 0, 2)).reshape(flat, 128)
    kp["fb1"] = fb1
    ncp = pl.cdiv(num_classes, 128) * 128                           # lane-dense pad
    kp["fw2"] = jnp.zeros((128, ncp), bf16).at[:, :num_classes].set(fw2q)
    kp["fb2"] = jnp.zeros((1, ncp), f32).at[:, :num_classes].set(fb2)

    # Reference params: same (de-quantized) effective weights, PyTorch layouts.
    ref = {"w1": w1f, "b1": b1f,
           "w2": w2q.astype(f32), "b2": b2f,
           "w3": w3q.astype(f32), "b3": b3f,
           "fw1": fw1q.astype(f32), "fb1": fb1,
           "fw2": fw2q.astype(f32), "fb2": fb2}
    return ref, kp


# ---------------------------------------------------------------------------
# Pure-JAX reference (PyTorch semantics, BN folded exactly) for validation
# ---------------------------------------------------------------------------
def _ref_stage(x, w, b):
    B, L, _ = x.shape
    K, _, cout = w.shape
    Lc = L - K + 1
    acc = jnp.zeros((B, Lc, cout), jnp.float32)
    for k in range(K):
        acc = acc + jnp.einsum("blc,cd->bld", x[:, k:k + Lc, :], w[k],
                               precision=jax.lax.Precision.HIGHEST)
    y = jnp.maximum(acc + b, 0.0)
    Lp = Lc // 2
    return jnp.max(y[:, :2 * Lp].reshape(B, Lp, 2, cout), axis=2)


def _ref_forward(x_nlc, p):
    h = _ref_stage(x_nlc, p["w1"], p["b1"])
    h = _ref_stage(h, p["w2"], p["b2"])
    h = _ref_stage(h, p["w3"], p["b3"])
    B, Lp, C = h.shape
    h = jnp.transpose(h, (0, 2, 1)).reshape(B, C * Lp)   # PyTorch x.view(B, -1)
    h = jnp.maximum(
        jnp.dot(h, p["fw1"], precision=jax.lax.Precision.HIGHEST) + p["fb1"],
        0.0)
    return jnp.dot(h, p["fw2"], precision=jax.lax.Precision.HIGHEST) + p["fb2"]


# ---------------------------------------------------------------------------
if __name__ == "__main__":
    B = 2
    input_size = 38          # sequence length L (PyTorch input: (B, 1, L))
    num_classes = 5

    key = jax.random.PRNGKey(0)
    k_x, k_p = jax.random.split(key)

    x_ncl = jax.random.normal(k_x, (B, 1, input_size), jnp.float32)
    refp, kparams = make_params(input_size, num_classes, B, k_p)

    fwd = jax.jit(functools.partial(deep1dcnn_forward, params=kparams,
                                    num_classes=num_classes))
    out = jax.block_until_ready(fwd(x_ncl))
    assert out.shape == (B, num_classes), out.shape

    ref = jax.block_until_ready(
        _ref_forward(jnp.transpose(x_ncl, (0, 2, 1)), refp))
    np.testing.assert_allclose(np.asarray(out), np.asarray(ref),
                               rtol=1e-3, atol=2e-3)

    print("KERNEL_OK")
</pallas_src>

<mosaic_0001>
module attributes {stable_mosaic.version = 11 : i64} {
  func.func @_deep1dcnn_kernel(%arg0: memref<74x3xf32, #tpu.memory_space<vmem>>, %arg1: memref<3x64xf32, #tpu.memory_space<vmem>>, %arg2: memref<1x64xf32, #tpu.memory_space<vmem>>, %arg3: memref<64x384xbf16, #tpu.memory_space<vmem>>, %arg4: memref<1x128xf32, #tpu.memory_space<vmem>>, %arg5: memref<128x768xbf16, #tpu.memory_space<any>>, %arg6: memref<1x256xf32, #tpu.memory_space<vmem>>, %arg7: memref<36x73xf32, #tpu.memory_space<vmem>>, %arg8: memref<16x33xf32, #tpu.memory_space<vmem>>, %arg9: memref<3x2x13xf32, #tpu.memory_space<vmem>>, %arg10: memref<768x128xbf16, #tpu.memory_space<any>>, %arg11: memref<1x128xf32, #tpu.memory_space<vmem>>, %arg12: memref<128x128xbf16, #tpu.memory_space<any>>, %arg13: memref<1x128xf32, #tpu.memory_space<vmem>>, %arg14: memref<2x128xf32, #tpu.memory_space<vmem>>, %arg15: memref<128x768xbf16, #tpu.memory_space<vmem>>, %arg16: memref<768x128xbf16, #tpu.memory_space<vmem>>, %arg17: memref<128x128xbf16, #tpu.memory_space<vmem>>, %arg18: memref<3x!tpu.dma_semaphore, #tpu.memory_space<semaphore_mem>>) attributes {dimension_semantics = [], scalar_prefetch = 0 : i64, scratch_operands = 4 : i64, tpu.core_type = #tpu.core_type<tc>} {
    %c0_i32 = arith.constant 0 : i32
    %0 = tpu.memref_slice %arg18[%c0_i32] : memref<3x!tpu.dma_semaphore, #tpu.memory_space<semaphore_mem>> -> memref<1x!tpu.dma_semaphore, #tpu.memory_space<semaphore_mem>>
    %1 = tpu.memref_squeeze %0 : memref<1x!tpu.dma_semaphore, #tpu.memory_space<semaphore_mem>> -> memref<!tpu.dma_semaphore, #tpu.memory_space<semaphore_mem>>
    tpu.enqueue_dma source(%arg5 : memref<128x768xbf16, #tpu.memory_space<any>>) target(%arg15 : memref<128x768xbf16, #tpu.memory_space<vmem>>) target_semaphore(%1 : memref<!tpu.dma_semaphore, #tpu.memory_space<semaphore_mem>>)
    %c1_i32 = arith.constant 1 : i32
    %2 = tpu.memref_slice %arg18[%c1_i32] : memref<3x!tpu.dma_semaphore, #tpu.memory_space<semaphore_mem>> -> memref<1x!tpu.dma_semaphore, #tpu.memory_space<semaphore_mem>>
    %3 = tpu.memref_squeeze %2 : memref<1x!tpu.dma_semaphore, #tpu.memory_space<semaphore_mem>> -> memref<!tpu.dma_semaphore, #tpu.memory_space<semaphore_mem>>
    tpu.enqueue_dma source(%arg10 : memref<768x128xbf16, #tpu.memory_space<any>>) target(%arg16 : memref<768x128xbf16, #tpu.memory_space<vmem>>) target_semaphore(%3 : memref<!tpu.dma_semaphore, #tpu.memory_space<semaphore_mem>>)
    %c2_i32 = arith.constant 2 : i32
    %4 = tpu.memref_slice %arg18[%c2_i32] : memref<3x!tpu.dma_semaphore, #tpu.memory_space<semaphore_mem>> -> memref<1x!tpu.dma_semaphore, #tpu.memory_space<semaphore_mem>>
    %5 = tpu.memref_squeeze %4 : memref<1x!tpu.dma_semaphore, #tpu.memory_space<semaphore_mem>> -> memref<!tpu.dma_semaphore, #tpu.memory_space<semaphore_mem>>
    tpu.enqueue_dma source(%arg12 : memref<128x128xbf16, #tpu.memory_space<any>>) target(%arg17 : memref<128x128xbf16, #tpu.memory_space<vmem>>) target_semaphore(%5 : memref<!tpu.dma_semaphore, #tpu.memory_space<semaphore_mem>>)
    %c0 = arith.constant 0 : index
    %c0_0 = arith.constant 0 : index
    %6 = vector.load %arg0[%c0, %c0_0] : memref<74x3xf32, #tpu.memory_space<vmem>>, vector<74x3xf32>
    %c0_1 = arith.constant 0 : index
    %c0_2 = arith.constant 0 : index
    %7 = vector.load %arg1[%c0_1, %c0_2] : memref<3x64xf32, #tpu.memory_space<vmem>>, vector<3x64xf32>
    %cst = arith.constant dense<0.000000e+00> : vector<74x64xf32>
    %8 = tpu.matmul %6, %7, %cst {dimension_numbers = #tpu.dot_dimension_numbers<[1], [0], [0], [1], [0, 0, 1, 1], [], []>} : vector<74x3xf32>, vector<3x64xf32>, vector<74x64xf32> -> vector<74x64xf32>
    %c0_3 = arith.constant 0 : index
    %c0_4 = arith.constant 0 : index
    %9 = vector.load %arg2[%c0_3, %c0_4] : memref<1x64xf32, #tpu.memory_space<vmem>>, vector<1x64xf32>
    %10 = vector.broadcast %9 : vector<1x64xf32> to vector<74x64xf32>
    %11 = arith.addf %8, %10 : vector<74x64xf32>
    %cst_5 = arith.constant 0.000000e+00 : f32
    %12 = vector.broadcast %cst_5 : f32 to vector<74x64xf32>
    %13 = arith.maximumf %11, %12 : vector<74x64xf32>
    %c0_6 = arith.constant 0 : index
    %c0_7 = arith.constant 0 : index
    %14 = vector.load %arg7[%c0_6, %c0_7] : memref<36x73xf32, #tpu.memory_space<vmem>>, vector<36x73xf32>
    %15 = vector.extract_strided_slice %13 {offsets = [0, 0], sizes = [73, 64], strides = [1, 1]} : vector<74x64xf32> to vector<73x64xf32>
    %16 = vector.extract_strided_slice %13 {offsets = [1, 0], sizes = [73, 64], strides = [1, 1]} : vector<74x64xf32> to vector<73x64xf32>
    %17 = arith.maximumf %15, %16 : vector<73x64xf32>
    %cst_8 = arith.constant dense<0.000000e+00> : vector<36x64xf32>
    %18 = tpu.matmul %14, %17, %cst_8 {dimension_numbers = #tpu.dot_dimension_numbers<[1], [0], [0], [1], [0, 0, 1, 1], [], []>} : vector<36x73xf32>, vector<73x64xf32>, vector<36x64xf32> -> vector<36x64xf32>
    %c0_9 = arith.constant 0 : index
    %c0_10 = arith.constant 0 : index
    %19 = vector.load %arg3[%c0_9, %c0_10] : memref<64x384xbf16, #tpu.memory_space<vmem>>, vector<64x384xbf16>
    %20 = arith.extf %19 : vector<64x384xbf16> to vector<64x384xf32>
    %c0_11 = arith.constant 0 : index
    %c0_12 = arith.constant 0 : index
    %21 = vector.load %arg4[%c0_11, %c0_12] : memref<1x128xf32, #tpu.memory_space<vmem>>, vector<1x128xf32>
    %cst_13 = arith.constant dense<0.000000e+00> : vector<36x384xf32>
    %22 = tpu.matmul %18, %20, %cst_13 {dimension_numbers = #tpu.dot_dimension_numbers<[1], [0], [0], [1], [0, 0, 1, 1], [], []>} : vector<36x64xf32>, vector<64x384xf32>, vector<36x384xf32> -> vector<36x384xf32>
    %23 = vector.extract_strided_slice %22 {offsets = [0, 0], sizes = [34, 128], strides = [1, 1]} : vector<36x384xf32> to vector<34x128xf32>
    %24 = vector.extract_strided_slice %22 {offsets = [1, 128], sizes = [34, 128], strides = [1, 1]} : vector<36x384xf32> to vector<34x128xf32>
    %25 = arith.addf %23, %24 : vector<34x128xf32>
    %26 = vector.extract_strided_slice %22 {offsets = [2, 256], sizes = [34, 128], strides = [1, 1]} : vector<36x384xf32> to vector<34x128xf32>
    %27 = arith.addf %25, %26 : vector<34x128xf32>
    %28 = vector.broadcast %21 : vector<1x128xf32> to vector<34x128xf32>
    %29 = arith.addf %27, %28 : vector<34x128xf32>
    %cst_14 = arith.constant 0.000000e+00 : f32
    %30 = vector.broadcast %cst_14 : f32 to vector<34x128xf32>
    %31 = arith.maximumf %29, %30 : vector<34x128xf32>
    %c0_15 = arith.constant 0 : index
    %c0_16 = arith.constant 0 : index
    %32 = vector.load %arg8[%c0_15, %c0_16] : memref<16x33xf32, #tpu.memory_space<vmem>>, vector<16x33xf32>
    %33 = vector.extract_strided_slice %31 {offsets = [0, 0], sizes = [33, 128], strides = [1, 1]} : vector<34x128xf32> to vector<33x128xf32>
    %34 = vector.extract_strided_slice %31 {offsets = [1, 0], sizes = [33, 128], strides = [1, 1]} : vector<34x128xf32> to vector<33x128xf32>
    %35 = arith.maximumf %33, %34 : vector<33x128xf32>
    %cst_17 = arith.constant dense<0.000000e+00> : vector<16x128xf32>
    %36 = tpu.matmul %32, %35, %cst_17 {dimension_numbers = #tpu.dot_dimension_numbers<[1], [0], [0], [1], [0, 0, 1, 1], [], []>} : vector<16x33xf32>, vector<33x128xf32>, vector<16x128xf32> -> vector<16x128xf32>
    %c0_i32_18 = arith.constant 0 : i32
    %37 = tpu.memref_slice %arg18[%c0_i32_18] : memref<3x!tpu.dma_semaphore, #tpu.memory_space<semaphore_mem>> -> memref<1x!tpu.dma_semaphore, #tpu.memory_space<semaphore_mem>>
    %38 = tpu.memref_squeeze %37 : memref<1x!tpu.dma_semaphore, #tpu.memory_space<semaphore_mem>> -> memref<!tpu.dma_semaphore, #tpu.memory_space<semaphore_mem>>
    tpu.wait_dma2 semaphore(%38 : memref<!tpu.dma_semaphore, #tpu.memory_space<semaphore_mem>>) src(%arg5 : memref<128x768xbf16, #tpu.memory_space<any>>) dst(%arg15 : memref<128x768xbf16, #tpu.memory_space<vmem>>)
    %c0_19 = arith.constant 0 : index
    %c0_20 = arith.constant 0 : index
    %39 = vector.load %arg15[%c0_19, %c0_20] : memref<128x768xbf16, #tpu.memory_space<vmem>>, vector<128x768xbf16>
    %40 = arith.extf %39 : vector<128x768xbf16> to vector<128x768xf32>
    %c0_21 = arith.constant 0 : index
    %c0_22 = arith.constant 0 : index
    %41 = vector.load %arg6[%c0_21, %c0_22] : memref<1x256xf32, #tpu.memory_space<vmem>>, vector<1x256xf32>
    %cst_23 = arith.constant dense<0.000000e+00> : vector<16x768xf32>
    %42 = tpu.matmul %36, %40, %cst_23 {dimension_numbers = #tpu.dot_dimension_numbers<[1], [0], [0], [1], [0, 0, 1, 1], [], []>} : vector<16x128xf32>, vector<128x768xf32>, vector<16x768xf32> -> vector<16x768xf32>
    %43 = vector.extract_strided_slice %42 {offsets = [0, 0], sizes = [14, 256], strides = [1, 1]} : vector<16x768xf32> to vector<14x256xf32>
    %44 = vector.extract_strided_slice %42 {offsets = [1, 256], sizes = [14, 256], strides = [1, 1]} : vector<16x768xf32> to vector<14x256xf32>
    %45 = arith.addf %43, %44 : vector<14x256xf32>
    %46 = vector.extract_strided_slice %42 {offsets = [2, 512], sizes = [14, 256], strides = [1, 1]} : vector<16x768xf32> to vector<14x256xf32>
    %47 = arith.addf %45, %46 : vector<14x256xf32>
    %48 = vector.broadcast %41 : vector<1x256xf32> to vector<14x256xf32>
    %49 = arith.addf %47, %48 : vector<14x256xf32>
    %cst_24 = arith.constant 0.000000e+00 : f32
    %50 = vector.broadcast %cst_24 : f32 to vector<14x256xf32>
    %51 = arith.maximumf %49, %50 : vector<14x256xf32>
    %52 = vector.extract_strided_slice %51 {offsets = [0, 0], sizes = [13, 256], strides = [1, 1]} : vector<14x256xf32> to vector<13x256xf32>
    %53 = vector.extract_strided_slice %51 {offsets = [1, 0], sizes = [13, 256], strides = [1, 1]} : vector<14x256xf32> to vector<13x256xf32>
    %54 = arith.maximumf %52, %53 : vector<13x256xf32>
    %c0_25 = arith.constant 0 : index
    %c0_26 = arith.constant 0 : index
    %c0_27 = arith.constant 0 : index
    %55 = vector.load %arg9[%c0_25, %c0_26, %c0_27] : memref<3x2x13xf32, #tpu.memory_space<vmem>>, vector<1x2x13xf32>
    %56 = vector.shape_cast %55 : vector<1x2x13xf32> to vector<2x13xf32>
    %cst_28 = arith.constant dense<0.000000e+00> : vector<2x256xf32>
    %57 = tpu.matmul %56, %54, %cst_28 {dimension_numbers = #tpu.dot_dimension_numbers<[1], [0], [0], [1], [0, 0, 1, 1], [], []>} : vector<2x13xf32>, vector<13x256xf32>, vector<2x256xf32> -> vector<2x256xf32>
    %c1 = arith.constant 1 : index
    %c0_29 = arith.constant 0 : index
    %c0_30 = arith.constant 0 : index
    %58 = vector.load %arg9[%c1, %c0_29, %c0_30] : memref<3x2x13xf32, #tpu.memory_space<vmem>>, vector<1x2x13xf32>
    %59 = vector.shape_cast %58 : vector<1x2x13xf32> to vector<2x13xf32>
    %cst_31 = arith.constant dense<0.000000e+00> : vector<2x256xf32>
    %60 = tpu.matmul %59, %54, %cst_31 {dimension_numbers = #tpu.dot_dimension_numbers<[1], [0], [0], [1], [0, 0, 1, 1], [], []>} : vector<2x13xf32>, vector<13x256xf32>, vector<2x256xf32> -> vector<2x256xf32>
    %c2 = arith.constant 2 : index
    %c0_32 = arith.constant 0 : index
    %c0_33 = arith.constant 0 : index
    %61 = vector.load %arg9[%c2, %c0_32, %c0_33] : memref<3x2x13xf32, #tpu.memory_space<vmem>>, vector<1x2x13xf32>
    %62 = vector.shape_cast %61 : vector<1x2x13xf32> to vector<2x13xf32>
    %cst_34 = arith.constant dense<0.000000e+00> : vector<2x256xf32>
    %63 = tpu.matmul %62, %54, %cst_34 {dimension_numbers = #tpu.dot_dimension_numbers<[1], [0], [0], [1], [0, 0, 1, 1], [], []>} : vector<2x13xf32>, vector<13x256xf32>, vector<2x256xf32> -> vector<2x256xf32>
    %64 = tpu.concatenate %57, %60, %63 in 1 : vector<2x256xf32>, vector<2x256xf32>, vector<2x256xf32> -> vector<2x768xf32>
    %c1_i32_35 = arith.constant 1 : i32
    %65 = tpu.memref_slice %arg18[%c1_i32_35] : memref<3x!tpu.dma_semaphore, #tpu.memory_space<semaphore_mem>> -> memref<1x!tpu.dma_semaphore, #tpu.memory_space<semaphore_mem>>
    %66 = tpu.memref_squeeze %65 : memref<1x!tpu.dma_semaphore, #tpu.memory_space<semaphore_mem>> -> memref<!tpu.dma_semaphore, #tpu.memory_space<semaphore_mem>>
    tpu.wait_dma2 semaphore(%66 : memref<!tpu.dma_semaphore, #tpu.memory_space<semaphore_mem>>) src(%arg10 : memref<768x128xbf16, #tpu.memory_space<any>>) dst(%arg16 : memref<768x128xbf16, #tpu.memory_space<vmem>>)
    %c0_36 = arith.constant 0 : index
    %c0_37 = arith.constant 0 : index
    %67 = vector.load %arg16[%c0_36, %c0_37] : memref<768x128xbf16, #tpu.memory_space<vmem>>, vector<768x128xbf16>
    %68 = arith.extf %67 : vector<768x128xbf16> to vector<768x128xf32>
    %cst_38 = arith.constant dense<0.000000e+00> : vector<2x128xf32>
    %69 = tpu.matmul %64, %68, %cst_38 {dimension_numbers = #tpu.dot_dimension_numbers<[1], [0], [0], [1], [0, 0, 1, 1], [], []>} : vector<2x768xf32>, vector<768x128xf32>, vector<2x128xf32> -> vector<2x128xf32>
    %c0_39 = arith.constant 0 : index
    %c0_40 = arith.constant 0 : index
    %70 = vector.load %arg11[%c0_39, %c0_40] : memref<1x128xf32, #tpu.memory_space<vmem>>, vector<1x128xf32>
    %71 = vector.broadcast %70 : vector<1x128xf32> to vector<2x128xf32>
    %72 = arith.addf %69, %71 : vector<2x128xf32>
    %cst_41 = arith.constant 0.000000e+00 : f32
    %73 = vector.broadcast %cst_41 : f32 to vector<2x128xf32>
    %74 = arith.maximumf %72, %73 : vector<2x128xf32>
    %c2_i32_42 = arith.constant 2 : i32
    %75 = tpu.memref_slice %arg18[%c2_i32_42] : memref<3x!tpu.dma_semaphore, #tpu.memory_space<semaphore_mem>> -> memref<1x!tpu.dma_semaphore, #tpu.memory_space<semaphore_mem>>
    %76 = tpu.memref_squeeze %75 : memref<1x!tpu.dma_semaphore, #tpu.memory_space<semaphore_mem>> -> memref<!tpu.dma_semaphore, #tpu.memory_space<semaphore_mem>>
    tpu.wait_dma2 semaphore(%76 : memref<!tpu.dma_semaphore, #tpu.memory_space<semaphore_mem>>) src(%arg12 : memref<128x128xbf16, #tpu.memory_space<any>>) dst(%arg17 : memref<128x128xbf16, #tpu.memory_space<vmem>>)
    %c0_43 = arith.constant 0 : index
    %c0_44 = arith.constant 0 : index
    %77 = vector.load %arg17[%c0_43, %c0_44] : memref<128x128xbf16, #tpu.memory_space<vmem>>, vector<128x128xbf16>
    %78 = arith.extf %77 : vector<128x128xbf16> to vector<128x128xf32>
    %cst_45 = arith.constant dense<0.000000e+00> : vector<2x128xf32>
    %79 = tpu.matmul %74, %78, %cst_45 {dimension_numbers = #tpu.dot_dimension_numbers<[1], [0], [0], [1], [0, 0, 1, 1], [], []>} : vector<2x128xf32>, vector<128x128xf32>, vector<2x128xf32> -> vector<2x128xf32>
    %c0_46 = arith.constant 0 : index
    %c0_47 = arith.constant 0 : index
    %80 = vector.load %arg13[%c0_46, %c0_47] : memref<1x128xf32, #tpu.memory_space<vmem>>, vector<1x128xf32>
    %81 = vector.broadcast %80 : vector<1x128xf32> to vector<2x128xf32>
    %82 = arith.addf %79, %81 : vector<2x128xf32>
    %c0_48 = arith.constant 0 : index
    %c0_49 = arith.constant 0 : index
    %83 = vector.load %arg14[%c0_48, %c0_49] : memref<2x128xf32, #tpu.memory_space<vmem>>, vector<2x128xf32>
    tpu.vector_store %arg14[%c0_48, %c0_49], %82 {strides = array<i32>} : memref<2x128xf32, #tpu.memory_space<vmem>>, vector<2x128xf32>,
    return
  }
}

</mosaic_0001>

<bundles_post_ra>
// kernel: deep1dcnn_forward.1
= control target key start
LH: loop header
LB: loop body
LE: loop exit
PB: predicated region body
PF: predicated region fallthrough
CT: control target
= control target key end

     0   :  { %19 = vsyncpa [#allocation7], 0  ;;  %s2601_s0 = inlined_call_operand.vmem [shape: f32[74,3], index: 0, kind: input, shape index: {}]   ;;  %s2602_s1 = inlined_call_operand.hbm [shape: f32[3,64], index: 1, kind: input, shape index: {}]   ;;  %s2603_s2 = inlined_call_operand.hbm [shape: f32[1,64], index: 2, kind: input, shape index: {}]   ;;  %s2604_s3 = inlined_call_operand.vmem [shape: bf16[64,384], index: 3, kind: input, shape index: {}]   ;;  %s2605_s4 = inlined_call_operand.hbm [shape: f32[1,128], index: 4, kind: input, shape index: {}]   ;;  %s2606_s5 = inlined_call_operand.hbm [shape: bf16[128,768], index: 5, kind: input, shape index: {}]   ;;  %s2607_s6 = inlined_call_operand.vmem [shape: f32[1,256], index: 6, kind: input, shape index: {}]   ;;  %s2608_s7 = inlined_call_operand.hbm [shape: f32[36,73], index: 7, kind: input, shape index: {}]   ;;  %s2609_s8 = inlined_call_operand.vmem [shape: f32[16,33], index: 8, kind: input, shape index: {}]   ;;  %s2610_s9 = inlined_call_operand.hbm [shape: f32[3,2,13], index: 9, kind: input, shape index: {}]   ;;  %s2611_s10 = inlined_call_operand.hbm [shape: bf16[768,128], index: 10, kind: input, shape index: {}]   ;;  %s2612_s11 = inlined_call_operand.vmem [shape: f32[1,128], index: 11, kind: input, shape index: {}]   ;;  %s2613_s12 = inlined_call_operand.hbm [shape: bf16[128,128], index: 12, kind: input, shape index: {}]   ;;  %s2614_s13 = inlined_call_operand.vmem [shape: f32[1,128], index: 13, kind: input, shape index: {}]   ;;  %s2615_s14 = inlined_call_operand.hbm [shape: f32[2,128], index: 14, kind: output, shape index: {}]  }
   0x1   :  { %20 = vsyncpa [#allocation10], 0 }
   0x2   :  { %21 = vsyncpa [#allocation13], 0  ;;  %s41_s15 = sshll.u32 %s2603_s2, 4  ;;  %s42_s15 = int_to_ptr.hbm [resolvable:$true] %s41_s15 }
   0x3   :  { %22 = vsyncpa [#allocation8], 0  ;;  %s2144_s16 = smov [#allocation9]   ;;  %s66_s20 = sshll.u32 %s2608_s7, 4  ;;  %s67_s20 = int_to_ptr.hbm [resolvable:$true] %s66_s20 }
   0x4   :  { %s43_s17 = sshll.u32 %s2144_s16, 4  ;;  %s2145_s21 = smov [#allocation12]   ;;  %s44_s17 = int_to_ptr.vmem [resolvable:$true] %s43_s17 }
   0x5   :  { %46 = dma.hbm_to_vmem [thread:$0]  %s42_s15, 16, %s44_s17, [#allocation10]  }
   0x6   :  { %s68_s22 = sshll.u32 %s2145_s21, 4  ;;  %s2146_s23 = smov 128   ;;  %s69_s22 = int_to_ptr.vmem [resolvable:$true] %s68_s22 }
   0x7   :  { %s2147_s24 = smov 8   ;;  %s30_s2 = sshll.u32 %s2602_s1, 4  ;;  %s31_s2 = int_to_ptr.hbm [resolvable:$true] %s30_s2 }
   0x8   :  { %74 = dma.hbm_to_vmem [thread:$0]  %s67_s20, 640, %s69_s22, [#allocation13], %s2146_s23, %s2146_s23, %s2147_s24  }
   0x9   :  { %s2148_s27 = smov [#allocation6]   ;;  %s54_s7 = sshll.u32 %s2605_s4, 4  ;;  %s55_s7 = int_to_ptr.hbm [resolvable:$true] %s54_s7 }
   0xa   :  { %s32_s28 = sshll.u32 %s2148_s27, 4  ;;  %s2149_s15 = smov [#allocation11]   ;;  %s33_s28 = int_to_ptr.vmem [resolvable:$true] %s32_s28 }
   0xb   :  { %35 = dma.hbm_to_vmem [thread:$0]  %s31_s2, 64, %s33_s28, [#allocation7]  }
   0xc   :  { %s56_s16 = sshll.u32 %s2149_s15, 4  ;;  %s81_s19 = sshll.u32 %s2610_s9, 4  ;;  %s57_s16 = int_to_ptr.vmem [resolvable:$true] %s56_s16  ;;  %s82_s19 = int_to_ptr.hbm [resolvable:$true] %s81_s19 }
   0xd   :  { %59 = dma.hbm_to_vmem [thread:$0]  %s55_s7, 16, %s57_s16, [#allocation10]  }
   0xe   :  { %s2150_s1 = smov [#allocation14]   ;;  %s2151_s21 = smov 32  }
   0xf   :  { %s83_s20 = sshll.u32 %s2150_s1, 4  ;;  %s2152_s22 = smov 2   ;;  %s84_s20 = int_to_ptr.vmem [resolvable:$true] %s83_s20 }
  0x10   :  { %89 = dma.hbm_to_vmem [thread:$0]  %s82_s19, 96, %s84_s20, [#allocation13], %s2151_s21, %s2151_s21, %s2152_s22  }
  0x11   :  { %2130 = dma.done.wait [#allocation7], 64  }
  0x12   :  { %2131 = vsyncadd [#allocation7], 4294967232 }
  0x13   :  { %2132 = dma.done.wait [#allocation10], 32  }
  0x14   :  { %2133 = vsyncadd [#allocation10], 4294967264 }
  0x15   :  { %2134 = dma.done.wait [#allocation13], 736  }
  0x16   :  { %2135 = vsyncadd [#allocation13], 4294966560  ;;  %vm201_vm0 = vcmask 1042432   ;;  %vm170_vm1 = vcmask 23552   ;;  %v165_v0 = vld [vmem:[#allocation6] sm:$0x7] }
  0x17   :  { %v155_v1 = vld [vmem:[%s2601_s0] sm:$0xff]  ;;  %1559 = vmatpush.msk.msra.mxu0 %vm201_vm0, %v165_v0  ;;  %v156_v2 = vld [vmem:[%s2601_s0 + $0x8] sm:$0xff]  ;;  %v157_v3 = vld [vmem:[%s2601_s0 + $0x10] sm:$0xff]  ;;  %vm277_vm2 = vcmask 1046528   ;;  %vm333_vm3 = vcmask 1040384   ;;  %vm317_vm4 = vcmask 596992  }
  0x18   :  { %1560 = vmatmul.msk.f32.vlgmr.msra.gmra.mxu0 %vm170_vm1, %v155_v1  ;;  %v158_v4 = vld [vmem:[%s2601_s0 + $0x18] sm:$0xff]  ;;  %v159_v5 = vld [vmem:[%s2601_s0 + $0x20] sm:$0xff]  ;;  %v160_v6 = vld [vmem:[%s2601_s0 + $0x28] sm:$0xff]  ;;  %vm410_vm5 = vcmask 523264   ;;  %vm551_vm6 = vcmask 1045504   ;;  %vm610_vm7 = vcmask 269312  }
  0x19   :  { %v161_v7 = vld [vmem:[%s2601_s0 + $0x30] sm:$0xff]  ;;  %v162_v8 = vld [vmem:[%s2601_s0 + $0x38] sm:$0xff]  ;;  %v163_v9 = vld [vmem:[%s2601_s0 + $0x40] sm:$0xff]  ;;  %s121_s7 = sshll.u32 %s2606_s5, 4  ;;  %s2153_s15 = smov [#allocation2]   ;;  %s122_s7 = int_to_ptr.hbm [resolvable:$true] %s121_s7 }
  0x1a   :  { %v164_v10 = vld [vmem:[%s2601_s0 + $0x48] sm:$0x3]  ;;  %v1910_v12 = vld [vmem:[#allocation9] ss:$0 sm:$0xff]  ;;  %s123_s16 = sshll.u32 %s2153_s15, 4  ;;  %s135_s20 = sshll.u32 %s2611_s10, 4  ;;  %s124_s16 = int_to_ptr.vmem [resolvable:$true] %s123_s16  ;;  %s136_s20 = int_to_ptr.hbm [resolvable:$true] %s135_s20 }
  0x1b   :  { %126 = dma.hbm_to_vmem [thread:$0]  %s122_s7, 6144, %s124_s16, [#allocation5] }
  0x1c   :  { %s2154_s21 = smov [#allocation3]   ;;  %s149_s5 = sshll.u32 %s2613_s12, 4  ;;  %s150_s5 = int_to_ptr.hbm [resolvable:$true] %s149_s5 }
  0x1d   :  { %s137_s0 = sshll.u32 %s2154_s21, 4  ;;  %s2155_s9 = smov [#allocation4]   ;;  %s138_s0 = int_to_ptr.vmem [resolvable:$true] %s137_s0 }
  0x1e   :  { %140 = dma.hbm_to_vmem [thread:$0]  %s136_s20, 6144, %s138_s0, [#allocation5 + $0x1] }
  0x1f   :  { %s151_s23 = sshll.u32 %s2155_s9, 4  ;;  %s152_s23 = int_to_ptr.vmem [resolvable:$true] %s151_s23 }
  0x20   :  { %1561 = vmatmul.msk.f32.gmra.mxu0 %vm170_vm1, %v156_v2  ;;  %154 = dma.hbm_to_vmem [thread:$0]  %s150_s5, 1024, %s152_s23, [#allocation5 + $0x2] }
  0x28   :  { %1562 = vmatmul.msk.f32.gmra.mxu0 %vm170_vm1, %v157_v3 }
  0x30   :  { %1563 = vmatmul.msk.f32.gmra.mxu0 %vm170_vm1, %v158_v4 }
  0x38   :  { %1564 = vmatmul.msk.f32.gmra.mxu0 %vm170_vm1, %v159_v5 }
  0x40   :  { %1565 = vmatmul.msk.f32.gmra.mxu0 %vm170_vm1, %v160_v6  ;;  %v383_v6 = vld [vmem:[%s2604_s3 + $0x54] sm:$0xff] }
  0x48   :  { %1566 = vmatmul.msk.f32.gmra.mxu0 %vm170_vm1, %v161_v7  ;;  %v381_v7 = vld [vmem:[%s2604_s3 + $0x48] sm:$0xff] }
  0x50   :  { %1567 = vmatmul.msk.f32.gmra.mxu0 %vm170_vm1, %v162_v8 }
  0x58   :  { %1568 = vmatmul.msk.f32.gmra.mxu0 %vm170_vm1, %v163_v9  ;;  %v407_v9 = vunpack.c.h.bf16 %v383_v6 }
  0x5a   :  { %466 = vmatpush.msra.mxu3 %v407_v9 }
  0x60   :  { %1569 = vmatmul.msk.f32.gmra.mxu0 %vm170_vm1, %v164_v10  ;;  %v404_v10 = vunpack.c.h.bf16 %v381_v7 }
  0x62   :  { %467 = vmatpush.msra.mxu3 %v404_v10 }
  0x95   :  { %v222_v11 = vpop.f32.mrf.mxu0 }
  0x96   :  { %v223_v13 = vadd.f32 %v1910_v12, %v222_v11  ;;  %v379_v11 = vld [vmem:[%s2604_s3 + $0x3c] sm:$0xff] }
  0x98   :  { %v252_v15 = vmax.f32 %v223_v13, 0.0  ;;  %v262_v13 = vld [vmem:[#allocation12] sm:$0xff] }
  0x9a   :  { %v278_v18 = vrot.slane %v252_v15, 1 }
  0x9d   :  { %v225_v14 = vpop.f32.mrf.mxu0 }
  0x9e   :  { %v226_v16 = vadd.f32 %v1910_v12, %v225_v14  ;;  %v266_v14 = vld [vmem:[#allocation12 + $0x20] sm:$0xf] }
  0xa0   :  { %v253_v17 = vmax.f32 %v226_v16, 0.0  ;;  %v401_v16 = vunpack.c.h.bf16 %v379_v11 }
  0xa2   :  { %v279_v19 = vrot.slane %v253_v17, 1  ;;  %468 = vmatpush.msra.mxu3 %v401_v16 }
  0xa4   :  { %v280_v20 = vsel %vm277_vm2, %v278_v18, %v279_v19  ;;  %v403_v18 = vunpack.c.l.bf16 %v381_v7 }
  0xa5   :  { %v228_v21 = vpop.f32.mrf.mxu0  ;;  %v2288_v22 = vmax.f32 %v252_v15, %v280_v20  ;;  %v406_v15 = vunpack.c.l.bf16 %v383_v6  ;;  %v373_v20 = vld [vmem:[%s2604_s3 + $0x18] sm:$0xff] }
  0xa6   :  { %v2290_v23 = vadd.f32 %v1910_v12, %v228_v21  ;;  %v400_v21 = vunpack.c.l.bf16 %v379_v11 }
  0xa8   :  { %v254_v24 = vmax.f32 %v2290_v23, 0.0 }
  0xaa   :  { %v281_v25 = vrot.slane %v254_v24, 1 }
  0xac   :  { %v282_v26 = vsel %vm277_vm2, %v279_v19, %v281_v25 }
  0xad   :  { %v231_v27 = vpop.f32.mrf.mxu0  ;;  %v2296_v28 = vmax.f32 %v253_v17, %v282_v26  ;;  %v375_v17 = vld [vmem:[%s2604_s3 + $0x24] sm:$0xff]  ;;  %v263_v26 = vld [vmem:[#allocation12 + $0x8] sm:$0xff] }
  0xae   :  { %v232_v47 = vadd.f32 %v1910_v12, %v231_v27  ;;  %v395_v23 = vunpack.c.h.bf16 %v375_v17  ;;  %v394_v27 = vunpack.c.l.bf16 %v375_v17 }
  0xb0   :  { %v255_v56 = vmax.f32 %v232_v47, 0.0  ;;  %v374_v47 = vld [vmem:[%s2604_s3 + $0x20] sm:$0xf] }
  0xb2   :  { %v283_v63 = vrot.slane %v255_v56, 1 }
  0xb4   :  { %v284_v4 = vsel %vm277_vm2, %v281_v25, %v283_v63  ;;  %v392_v25 = vunpack.c.h.bf16 %v373_v20 }
  0xb5   :  { %v234_v29 = vpop.f32.mrf.mxu0  ;;  %v309_v8 = vmax.f32 %v254_v24, %v284_v4  ;;  %v371_v24 = vld [vmem:[%s2604_s3 + $0xc] sm:$0xff] }
  0xb6   :  { %v235_v43 = vadd.f32 %v1910_v12, %v234_v29  ;;  %v391_v29 = vunpack.c.l.bf16 %v373_v20 }
  0xb8   :  { %v256_v52 = vmax.f32 %v235_v43, 0.0 }
  0xba   :  { %v285_v60 = vrot.slane %v256_v52, 1 }
  0xbc   :  { %v286_v2 = vsel %vm277_vm2, %v283_v63, %v285_v60 }
  0xbd   :  { %v237_v30 = vpop.f32.mrf.mxu0  ;;  %v310_v5 = vmax.f32 %v255_v56, %v286_v2 }
  0xbe   :  { %v238_v40 = vadd.f32 %v1910_v12, %v237_v30  ;;  %v388_v30 = vunpack.c.l.bf16 %v371_v24 }
  0xc0   :  { %v257_v48 = vmax.f32 %v238_v40, 0.0  ;;  %v378_v40 = vld [vmem:[%s2604_s3 + $0x38] sm:$0xf] }
  0xc1   :  { %v399_v43 = vunpack.c.l.bf16 %v378_v40 }
  0xc2   :  { %v287_v57 = vrot.slane %v257_v48, 1 }
  0xc4   :  { %v288_v0 = vsel %vm277_vm2, %v285_v60, %v287_v57 }
  0xc5   :  { %v240_v31 = vpop.f32.mrf.mxu0  ;;  %v311_v3 = vmax.f32 %v256_v52, %v288_v0 }
  0xc6   :  { %v241_v36 = vadd.f32 %v1910_v12, %v240_v31  ;;  %v264_v31 = vld [vmem:[#allocation12 + $0x10] sm:$0xff] }
  0xc8   :  { %v258_v44 = vmax.f32 %v241_v36, 0.0  ;;  %v384_v36 = vld [vmem:[%s2604_s3 + $0x5c] sm:$0xf] }
  0xca   :  { %v289_v53 = vrot.slane %v258_v44, 1 }
  0xcc   :  { %v290_v61 = vsel %vm277_vm2, %v287_v57, %v289_v53 }
  0xcd   :  { %v243_v32 = vpop.f32.mrf.mxu0  ;;  %v312_v1 = vmax.f32 %v257_v48, %v290_v61  ;;  %v372_v48 = vld [vmem:[%s2604_s3 + $0x14] sm:$0xf] }
  0xce   :  { %v244_v35 = vadd.f32 %v1910_v12, %v243_v32  ;;  %v265_v32 = vld [vmem:[#allocation12 + $0x18] sm:$0xff] }
  0xd0   :  { %v259_v41 = vmax.f32 %v244_v35, 0.0 }
  0xd2   :  { %v291_v49 = vrot.slane %v259_v41, 1 }
  0xd4   :  { %v292_v58 = vsel %vm277_vm2, %v289_v53, %v291_v49 }
  0xd5   :  { %v246_v33 = vpop.f32.mrf.mxu0  ;;  %v313_v62 = vmax.f32 %v258_v44, %v292_v58  ;;  %v376_v44 = vld [vmem:[%s2604_s3 + $0x2c] sm:$0xf] }
  0xd6   :  { %v247_v34 = vadd.f32 %v1910_v12, %v246_v33  ;;  %v369_v33 = vld [vmem:[%s2604_s3] sm:$0xff] }
  0xd7   :  { %v386_v35 = vunpack.c.h.bf16 %v369_v33 }
  0xd8   :  { %v260_v37 = vmax.f32 %v247_v34, 0.0  ;;  %v385_v34 = vunpack.c.l.bf16 %v369_v33 }
  0xda   :  { %v293_v45 = vrot.slane %v260_v37, 1 }
  0xdc   :  { %v294_v55 = vsel %vm277_vm2, %v291_v49, %v293_v45  ;;  %v370_v49 = vld [vmem:[%s2604_s3 + $0x8] sm:$0xf] }
  0xdd   :  { %v249_v38 = vpop.f32.mrf.mxu0  ;;  %v314_v59 = vmax.f32 %v259_v41, %v294_v55  ;;  %v387_v52 = vunpack.c.l.bf16 %v370_v49 }
  0xde   :  { %v250_v39 = vadd.f32 %v1910_v12, %v249_v38  ;;  %v377_v12 = vld [vmem:[%s2604_s3 + $0x30] sm:$0xff] }
  0xdf   :  { %v398_v19 = vunpack.c.h.bf16 %v377_v12  ;;  %v382_v38 = vld [vmem:[%s2604_s3 + $0x50] sm:$0xf] }
  0xe0   :  { %v261_v42 = vmax.f32 %v250_v39, 0.0  ;;  %v380_v39 = vld [vmem:[%s2604_s3 + $0x44] sm:$0xf]  ;;  %v405_v41 = vunpack.c.l.bf16 %v382_v38 }
  0xe1   :  { %469 = vmatpush.msra.mxu3 %v398_v19 }
  0xe2   :  { %v295_v46 = vrot.slane %v261_v42, 1 }
  0xe3   :  { %470 = vmatpush.msra.mxu3 %v395_v23 }
  0xe4   :  { %v316_v50 = vmax.f32 %v261_v42, %v295_v46  ;;  %v296_v51 = vsel %vm277_vm2, %v293_v45, %v295_v46  ;;  %v402_v42 = vunpack.c.l.bf16 %v380_v39  ;;  %v396_v46 = vunpack.c.l.bf16 %v376_v44 }
  0xe5   :  { %v315_v54 = vmax.f32 %v260_v37, %v296_v51  ;;  %471 = vmatpush.msra.mxu3 %v392_v25  ;;  %v408_v37 = vunpack.c.l.bf16 %v384_v36  ;;  %v390_v51 = vunpack.c.l.bf16 %v372_v48 }
  0xe6   :  { %1570 = vmatpush.msk.msra.mxu1 %vm333_vm3, %v316_v50  ;;  %1887 = vmatpush.msk.msra.mxu2 %vm333_vm3, %v316_v50  ;;  %v393_v50 = vunpack.c.l.bf16 %v374_v47 }
  0xe8   :  { %344 = vmatpush.msra.mxu1 %v315_v54  ;;  %1888 = vmatpush.msra.mxu2 %v315_v54 }
  0xea   :  { %345 = vmatpush.msra.mxu1 %v314_v59  ;;  %1889 = vmatpush.msra.mxu2 %v314_v59 }
  0xec   :  { %346 = vmatpush.msra.mxu1 %v313_v62  ;;  %1890 = vmatpush.msra.mxu2 %v313_v62 }
  0xee   :  { %347 = vmatpush.msra.mxu1 %v312_v1  ;;  %1891 = vmatpush.msra.mxu2 %v312_v1 }
  0xf0   :  { %348 = vmatpush.msra.mxu1 %v311_v3  ;;  %1892 = vmatpush.msra.mxu2 %v311_v3 }
  0xf2   :  { %349 = vmatpush.msra.mxu1 %v310_v5  ;;  %1893 = vmatpush.msra.mxu2 %v310_v5 }
  0xf4   :  { %350 = vmatpush.msra.mxu1 %v309_v8  ;;  %1894 = vmatpush.msra.mxu2 %v309_v8 }
  0xf6   :  { %351 = vmatpush.msra.mxu1 %v2296_v28  ;;  %1895 = vmatpush.msra.mxu2 %v2296_v28  ;;  %v389_v28 = vunpack.c.h.bf16 %v371_v24 }
  0xf8   :  { %352 = vmatpush.msra.mxu1 %v2288_v22  ;;  %1896 = vmatpush.msra.mxu2 %v2288_v22  ;;  %v397_v22 = vunpack.c.l.bf16 %v377_v12  ;;  %v1911_v12 = vld [vmem:[#allocation11] ss:$0 sm:$0xff] }
  0xf9   :  { %1571 = vmatmul.msk.f32.vlgmr.msra.gmra.mxu1 %vm317_vm4, %v262_v13  ;;  %1575 = vmatmul.msk.f32.vlgmr.msra.gmra.mxu2 %vm317_vm4, %v266_v14 }
  0xfa   :  { %434 = vmatpush.msrb.mxu2 %v406_v15  ;;  %472 = vmatpush.msra.mxu3 %v389_v28 }
  0xfc   :  { %435 = vmatpush.msrb.mxu2 %v403_v18  ;;  %473 = vmatpush.msra.mxu3 %v386_v35 }
  0xfe   :  { %436 = vmatpush.msrb.mxu2 %v400_v21 }
 0x100   :  { %437 = vmatpush.msrb.mxu2 %v397_v22 }
 0x101   :  { %1572 = vmatmul.msk.f32.gmra.mxu1 %vm317_vm4, %v263_v26 }
 0x102   :  { %438 = vmatpush.msrb.mxu2 %v394_v27 }
 0x104   :  { %439 = vmatpush.msrb.mxu2 %v391_v29 }
 0x106   :  { %440 = vmatpush.msrb.mxu2 %v388_v30 }
 0x108   :  { %441 = vmatpush.msrb.mxu2 %v385_v34 }
 0x109   :  { %1573 = vmatmul.msk.f32.gmra.mxu1 %vm317_vm4, %v264_v31 }
 0x10a   :  { %498 = vmatpush.msra.mxu2 %v408_v37 }
 0x10c   :  { %499 = vmatpush.msra.mxu2 %v405_v41 }
 0x10e   :  { %500 = vmatpush.msra.mxu2 %v402_v42 }
 0x110   :  { %501 = vmatpush.msra.mxu2 %v399_v43 }
 0x111   :  { %1574 = vmatmul.msk.f32.gmra.mxu1 %vm317_vm4, %v265_v32 }
 0x112   :  { %502 = vmatpush.msra.mxu2 %v396_v46 }
 0x114   :  { %503 = vmatpush.msra.mxu2 %v393_v50 }
 0x116   :  { %504 = vmatpush.msra.mxu2 %v390_v51 }
 0x118   :  { %505 = vmatpush.msra.mxu2 %v387_v52 }
 0x176   :  { %v354_v45 = vpop.f32.mrf.mxu1 }
 0x177   :  { %1576 = vmatmul.msk.f32.vlgmr.msrb.gmra.mxu2 %vm410_vm5, %v354_v45  ;;  %1581 = vmatmul.msk.f32.vlgmr.msra.gmra.mxu3 %vm410_vm5, %v354_v45 }
 0x17c   :  { %v366_v56 = vpop.f32.mrf.mxu2 }
 0x17e   :  { %v357_v53 = vpop.f32.mrf.mxu1 }
 0x17f   :  { %1577 = vmatmul.msk.f32.gmra.mxu2 %vm410_vm5, %v357_v53  ;;  %1582 = vmatmul.msk.f32.gmra.mxu3 %vm410_vm5, %v357_v53 }
 0x186   :  { %v360_v54 = vpop.f32.mrf.mxu1 }
 0x187   :  { %1578 = vmatmul.msk.f32.gmra.mxu2 %vm410_vm5, %v360_v54  ;;  %1583 = vmatmul.msk.f32.gmra.mxu3 %vm410_vm5, %v360_v54 }
 0x18e   :  { %v363_v55 = vpop.f32.mrf.mxu1 }
 0x18f   :  { %1579 = vmatmul.msk.f32.gmra.mxu2 %vm410_vm5, %v363_v55  ;;  %1584 = vmatmul.msk.f32.gmra.mxu3 %vm410_vm5, %v363_v55 }
 0x197   :  { %1580 = vmatmul.msk.f32.gmra.mxu2 %vm410_vm5, %v366_v56  ;;  %1585 = vmatmul.msk.f32.gmra.mxu3 %vm410_vm5, %v366_v56 }
 0x19f   :  { %1586 = vmatmul.msk.f32.vlgmr.msra.gmra.mxu2 %vm410_vm5, %v354_v45 }
 0x1a7   :  { %1587 = vmatmul.msk.f32.gmra.mxu2 %vm410_vm5, %v357_v53 }
 0x1af   :  { %1588 = vmatmul.msk.f32.gmra.mxu2 %vm410_vm5, %v360_v54 }
 0x1b7   :  { %1589 = vmatmul.msk.f32.gmra.mxu2 %vm410_vm5, %v363_v55 }
 0x1bf   :  { %1590 = vmatmul.msk.f32.gmra.mxu2 %vm410_vm5, %v366_v56 }
 0x1fa   :  { %v443_v57 = vpop.f32.mrf.mxu2  ;;  %v475_v60 = vpop.f32.mrf.mxu3 }
 0x1fb   :  { %v527_v3 = vrot.slane %v475_v60, 1 }
 0x202   :  { %v446_v58 = vpop.f32.mrf.mxu2  ;;  %v478_v63 = vpop.f32.mrf.mxu3 }
 0x203   :  { %v528_v2 = vrot.slane %v478_v63, 1 }
 0x205   :  { %v529_v5 = vsel %vm277_vm2, %v527_v3, %v528_v2 }
 0x206   :  { %v541_v10 = vadd.f32 %v529_v5, %v443_v57 }
 0x20a   :  { %v449_v59 = vpop.f32.mrf.mxu2  ;;  %v481_v1 = vpop.f32.mrf.mxu3 }
 0x20b   :  { %v530_v8 = vrot.slane %v481_v1, 1 }
 0x20d   :  { %v531_v14 = vsel %vm277_vm2, %v528_v2, %v530_v8 }
 0x20e   :  { %v542_v17 = vadd.f32 %v531_v14, %v446_v58 }
 0x212   :  { %v452_v61 = vpop.f32.mrf.mxu2  ;;  %v484_v11 = vpop.f32.mrf.mxu3 }
 0x213   :  { %v532_v21 = vrot.slane %v484_v11, 1 }
 0x215   :  { %v533_v27 = vsel %vm277_vm2, %v530_v8, %v532_v21 }
 0x216   :  { %v543_v33 = vadd.f32 %v533_v27, %v449_v59 }
 0x21a   :  { %v455_v62 = vpop.f32.mrf.mxu2  ;;  %v487_v22 = vpop.f32.mrf.mxu3 }
 0x21b   :  { %v534_v31 = vrot.slane %v487_v22, 1 }
 0x21d   :  { %v535_v37 = vsel %vm277_vm2, %v532_v21, %v534_v31  ;;  %v545_v39 = vadd.f32 %v534_v31, %v455_v62  ;;  %v585_v62 = vld [vmem:[%s2609_s8 + $0x8] sm:$0xff] }
 0x21e   :  { %v544_v41 = vadd.f32 %v535_v37, %v452_v61  ;;  %v584_v61 = vld [vmem:[%s2609_s8] sm:$0xff] }
 0x222   :  { %v507_v0 = vpop.f32.mrf.mxu2 }
 0x223   :  { %v552_v6 = vrot.slane %v507_v0, 2 }
 0x22a   :  { %v510_v4 = vpop.f32.mrf.mxu2 }
 0x22b   :  { %v553_v7 = vrot.slane %v510_v4, 2 }
 0x22d   :  { %v554_v9 = vsel %vm551_vm6, %v552_v6, %v553_v7 }
 0x22e   :  { %v566_v13 = vadd.f32 %v554_v9, %v541_v10 }
 0x230   :  { %v574_v18 = vadd.f32 %v1911_v12, %v566_v13 }
 0x232   :  { %v513_v15 = vpop.f32.mrf.mxu2  ;;  %v579_v24 = vmax.f32 %v574_v18, 0.0 }
 0x233   :  { %v555_v16 = vrot.slane %v513_v15, 2 }
 0x234   :  { %v591_v30 = vrot.slane %v579_v24, 1 }
 0x235   :  { %v556_v19 = vsel %vm551_vm6, %v553_v7, %v555_v16 }
 0x236   :  { %v567_v20 = vadd.f32 %v556_v19, %v542_v17 }
 0x238   :  { %v575_v23 = vadd.f32 %v1911_v12, %v567_v20 }
 0x23a   :  { %v516_v25 = vpop.f32.mrf.mxu2  ;;  %v580_v26 = vmax.f32 %v575_v23, 0.0 }
 0x23b   :  { %v557_v28 = vrot.slane %v516_v25, 2 }
 0x23c   :  { %v592_v29 = vrot.slane %v580_v26, 1 }
 0x23d   :  { %v558_v32 = vsel %vm551_vm6, %v555_v16, %v557_v28 }
 0x23e   :  { %v593_v34 = vsel %vm277_vm2, %v591_v30, %v592_v29  ;;  %v568_v36 = vadd.f32 %v558_v32, %v543_v33 }
 0x23f   :  { %v605_v35 = vmax.f32 %v579_v24, %v593_v34 }
 0x240   :  { %v576_v42 = vadd.f32 %v1911_v12, %v568_v36 }
 0x242   :  { %v519_v38 = vpop.f32.mrf.mxu2  ;;  %v581_v48 = vmax.f32 %v576_v42, 0.0 }
 0x243   :  { %v559_v40 = vrot.slane %v519_v38, 2 }
 0x244   :  { %v594_v53 = vrot.slane %v581_v48, 1 }
 0x245   :  { %v560_v43 = vsel %vm551_vm6, %v557_v28, %v559_v40  ;;  %v570_v44 = vadd.f32 %v559_v40, %v545_v39 }
 0x246   :  { %v569_v45 = vadd.f32 %v560_v43, %v544_v41  ;;  %v595_v58 = vsel %vm277_vm2, %v592_v29, %v594_v53 }
 0x247   :  { %v578_v46 = vadd.f32 %v1911_v12, %v570_v44  ;;  %v606_v60 = vmax.f32 %v580_v26, %v595_v58 }
 0x248   :  { %v577_v47 = vadd.f32 %v1911_v12, %v569_v45 }
 0x249   :  { %v583_v49 = vmax.f32 %v578_v46, 0.0 }
 0x24a   :  { %v582_v50 = vmax.f32 %v577_v47, 0.0 }
 0x24b   :  { %v598_v51 = vrot.slane %v583_v49, 1 }
 0x24c   :  { %v596_v52 = vrot.slane %v582_v50, 1 }
 0x24d   :  { %v609_v54 = vmax.f32 %v583_v49, %v598_v51 }
 0x24e   :  { %v599_v55 = vsel %vm277_vm2, %v596_v52, %v598_v51  ;;  %v597_v56 = vsel %vm277_vm2, %v594_v53, %v596_v52 }
 0x24f   :  { %1591 = vmatpush.msk.msrb.mxu3 %vm333_vm3, %v609_v54  ;;  %v608_v57 = vmax.f32 %v582_v50, %v599_v55  ;;  %v607_v59 = vmax.f32 %v581_v48, %v597_v56 }
 0x251   :  { %632 = vmatpush.msrb.mxu3 %v608_v57 }
 0x253   :  { %633 = vmatpush.msrb.mxu3 %v607_v59 }
 0x255   :  { %634 = vmatpush.msrb.mxu3 %v606_v60 }
 0x257   :  { %635 = vmatpush.msrb.mxu3 %v605_v35 }
 0x258   :  { %1592 = vmatmul.msk.f32.vlgmr.msrb.gmra.mxu3 %vm610_vm7, %v584_v61 }
 0x260   :  { %1593 = vmatmul.msk.f32.gmra.mxu3 %vm610_vm7, %v585_v62 }
 0x2db   :  { %v2409_v63 = vpop.f32.mrf.mxu3 }
 0x2e3   :  { %v2411_v0 = vpop.f32.mrf.mxu3 }
 0x2e4   :  { %2136 = dma.done.wait [#allocation5], 6144 }
 0x2e5   :  { %2137 = vsyncadd [#allocation5], 4294961152  ;;  %v692_v1 = vld [vmem:[#allocation2 + $0x168] sm:$0xff]  ;;  %v2413_v2 = vld [vmem:[#allocation2 + $0x170] sm:$0xff]  ;;  %vm1002_vm8 = vcmask 1044480   ;;  %vm998_vm9 = vcmask 105472  }
 0x2e6   :  { %v689_v3 = vld [vmem:[#allocation2 + $0x150] sm:$0xff]  ;;  %v785_v4 = vunpack.c.l.bf16 %v692_v1  ;;  %v786_v5 = vunpack.c.h.bf16 %v692_v1  ;;  %v787_v6 = vunpack.c.l.bf16 %v2413_v2  ;;  %v2416_v8 = vld [vmem:[#allocation2 + $0x158] sm:$0xff]  ;;  %v2422_v14 = vld [vmem:[#allocation2 + $0x140] sm:$0xff] }
 0x2e7   :  { %v779_v7 = vunpack.c.l.bf16 %v689_v3  ;;  %v2418_v9 = vld [vmem:[#allocation2 + $0x178] sm:$0xff]  ;;  %v780_v11 = vunpack.c.h.bf16 %v689_v3  ;;  %v781_v12 = vunpack.c.l.bf16 %v2416_v8  ;;  %v2424_v15 = vld [vmem:[#allocation2 + $0x160] sm:$0xff]  ;;  %v2427_v20 = vld [vmem:[#allocation2 + $0x128] sm:$0xff]  ;;  %v775_v23 = vunpack.c.l.bf16 %v2422_v14 }
 0x2e8   :  { %v686_v10 = vld [vmem:[#allocation2 + $0x138] sm:$0xff]  ;;  %v789_v13 = vunpack.c.l.bf16 %v2418_v9  ;;  %v683_v16 = vld [vmem:[#allocation2 + $0x120] sm:$0xff]  ;;  %792 = vmatpush.msrb.mxu1 %v785_v4  ;;  %815 = vmatpush.msrb.mxu0 %v786_v5  ;;  %v783_v19 = vunpack.c.l.bf16 %v2424_v15  ;;  %v2429_v21 = vld [vmem:[#allocation2 + $0x148] sm:$0xff]  ;;  %v769_v30 = vunpack.c.l.bf16 %v2427_v20 }
 0x2e9   :  { %v773_v17 = vunpack.c.l.bf16 %v686_v10  ;;  %v774_v18 = vunpack.c.h.bf16 %v686_v10  ;;  %838 = vmatpush.msra.mxu3 %v787_v6  ;;  %v777_v24 = vunpack.c.l.bf16 %v2429_v21  ;;  %v680_v22 = vld [vmem:[#allocation2 + $0x108] sm:$0xff]  ;;  %v2433_v25 = vld [vmem:[#allocation2 + $0x130] sm:$0xff]  ;;  %v767_v26 = vunpack.c.l.bf16 %v683_v16  ;;  %v2437_v29 = vld [vmem:[#allocation2 + $0x118] sm:$0xff] }
 0x2ea   :  { %884 = vmatpush.msrb.mxu2 %v789_v13  ;;  %793 = vmatpush.msrb.mxu1 %v779_v7  ;;  %v768_v27 = vunpack.c.h.bf16 %v683_v16  ;;  %v2435_v28 = vld [vmem:[#allocation2 + $0x110] sm:$0xff]  ;;  %v771_v31 = vunpack.c.l.bf16 %v2433_v25  ;;  %v761_v33 = vunpack.c.l.bf16 %v680_v22  ;;  %v762_v34 = vunpack.c.h.bf16 %v680_v22  ;;  %v2441_v35 = vld [vmem:[#allocation2 + $0xf8] sm:$0xff]  ;;  %v2443_v36 = vld [vmem:[#allocation2 + $0x100] sm:$0xff] }
 0x2eb   :  { %816 = vmatpush.msrb.mxu0 %v780_v11  ;;  %839 = vmatpush.msra.mxu3 %v781_v12  ;;  %v677_v32 = vld [vmem:[#allocation2 + $0xf0] sm:$0xff]  ;;  %v763_v37 = vunpack.c.l.bf16 %v2435_v28  ;;  %v765_v38 = vunpack.c.l.bf16 %v2437_v29  ;;  %v674_v39 = vld [vmem:[#allocation2 + $0xd8] sm:$0xff]  ;;  %v2447_v42 = vld [vmem:[#allocation2 + $0xe0] sm:$0xff]  ;;  %v757_v44 = vunpack.c.l.bf16 %v2441_v35  ;;  %v759_v45 = vunpack.c.l.bf16 %v2443_v36 }
 0x2ec   :  { %885 = vmatpush.msrb.mxu2 %v783_v19  ;;  %794 = vmatpush.msrb.mxu1 %v773_v17  ;;  %v755_v40 = vunpack.c.l.bf16 %v677_v32  ;;  %v756_v41 = vunpack.c.h.bf16 %v677_v32  ;;  %v2449_v43 = vld [vmem:[#allocation2 + $0xe8] sm:$0xff]  ;;  %v671_v46 = vld [vmem:[#allocation2 + $0xc0] sm:$0xff]  ;;  %v749_v47 = vunpack.c.l.bf16 %v674_v39  ;;  %v750_v48 = vunpack.c.h.bf16 %v674_v39  ;;  %v2455_v50 = vld [vmem:[#allocation2 + $0xd0] sm:$0xff] }
 0x2ed   :  { %817 = vmatpush.msrb.mxu0 %v774_v18  ;;  %840 = vmatpush.msra.mxu3 %v775_v23  ;;  %v2453_v49 = vld [vmem:[#allocation2 + $0xc8] sm:$0xff]  ;;  %v751_v51 = vunpack.c.l.bf16 %v2447_v42  ;;  %v753_v52 = vunpack.c.l.bf16 %v2449_v43  ;;  %v743_v54 = vunpack.c.l.bf16 %v671_v46  ;;  %v744_v55 = vunpack.c.h.bf16 %v671_v46  ;;  %v2459_v56 = vld [vmem:[#allocation2 + $0xb0] sm:$0xff]  ;;  %v2461_v57 = vld [vmem:[#allocation2 + $0xb8] sm:$0xff] }
 0x2ee   :  { %886 = vmatpush.msrb.mxu2 %v777_v24  ;;  %795 = vmatpush.msrb.mxu1 %v767_v26  ;;  %v668_v53 = vld [vmem:[#allocation2 + $0xa8] sm:$0xff]  ;;  %v745_v58 = vunpack.c.l.bf16 %v2453_v49  ;;  %v747_v59 = vunpack.c.l.bf16 %v2455_v50  ;;  %v665_v60 = vld [vmem:[#allocation2 + $0x90] sm:$0xff]  ;;  %v2465_v1 = vld [vmem:[#allocation2 + $0x98] sm:$0xff]  ;;  %v739_v4 = vunpack.c.l.bf16 %v2459_v56  ;;  %v741_v5 = vunpack.c.l.bf16 %v2461_v57 }
 0x2ef   :  { %818 = vmatpush.msrb.mxu0 %v768_v27  ;;  %841 = vmatpush.msra.mxu3 %v769_v30  ;;  %v737_v61 = vunpack.c.l.bf16 %v668_v53  ;;  %v738_v62 = vunpack.c.h.bf16 %v668_v53  ;;  %v2467_v3 = vld [vmem:[#allocation2 + $0xa0] sm:$0xff]  ;;  %v662_v6 = vld [vmem:[#allocation2 + $0x78] sm:$0xff]  ;;  %v731_v7 = vunpack.c.l.bf16 %v665_v60  ;;  %v732_v10 = vunpack.c.h.bf16 %v665_v60  ;;  %v2473_v12 = vld [vmem:[#allocation2 + $0x88] sm:$0xff] }
 0x2f0   :  { %887 = vmatpush.msrb.mxu2 %v771_v31  ;;  %796 = vmatpush.msrb.mxu1 %v761_v33  ;;  %v2471_v11 = vld [vmem:[#allocation2 + $0x80] sm:$0xff]  ;;  %v733_v13 = vunpack.c.l.bf16 %v2465_v1  ;;  %v735_v16 = vunpack.c.l.bf16 %v2467_v3  ;;  %v725_v18 = vunpack.c.l.bf16 %v662_v6  ;;  %v726_v19 = vunpack.c.h.bf16 %v662_v6  ;;  %v2477_v23 = vld [vmem:[#allocation2 + $0x68] sm:$0xff]  ;;  %v2479_v24 = vld [vmem:[#allocation2 + $0x70] sm:$0xff] }
 0x2f1   :  { %819 = vmatpush.msrb.mxu0 %v762_v34  ;;  %842 = vmatpush.msra.mxu3 %v763_v37  ;;  %v659_v17 = vld [vmem:[#allocation2 + $0x60] sm:$0xff]  ;;  %v727_v22 = vunpack.c.l.bf16 %v2471_v11  ;;  %v729_v26 = vunpack.c.l.bf16 %v2473_v12  ;;  %v656_v27 = vld [vmem:[#allocation2 + $0x48] sm:$0xff]  ;;  %v2483_v32 = vld [vmem:[#allocation2 + $0x50] sm:$0xff]  ;;  %v721_v34 = vunpack.c.l.bf16 %v2477_v23  ;;  %v723_v37 = vunpack.c.l.bf16 %v2479_v24 }
 0x2f2   :  { %888 = vmatpush.msrb.mxu2 %v765_v38  ;;  %797 = vmatpush.msrb.mxu1 %v755_v40  ;;  %v719_v30 = vunpack.c.l.bf16 %v659_v17  ;;  %v720_v31 = vunpack.c.h.bf16 %v659_v17  ;;  %v2485_v33 = vld [vmem:[#allocation2 + $0x58] sm:$0xff]  ;;  %v653_v38 = vld [vmem:[#allocation2 + $0x30] sm:$0xff]  ;;  %v713_v39 = vunpack.c.l.bf16 %v656_v27  ;;  %v714_v40 = vunpack.c.h.bf16 %v656_v27  ;;  %v2497_v53 = vld [vmem:[#allocation2 + $0x28] sm:$0xff] }
 0x2f3   :  { %820 = vmatpush.msrb.mxu0 %v756_v41  ;;  %843 = vmatpush.msra.mxu3 %v757_v44  ;;  %v2489_v41 = vld [vmem:[#allocation2 + $0x38] sm:$0xff]  ;;  %v2491_v44 = vld [vmem:[#allocation2 + $0x40] sm:$0xff]  ;;  %v717_v46 = vunpack.c.l.bf16 %v2485_v33  ;;  %v724_v27 = vunpack.c.h.bf16 %v2479_v24 }
 0x2f4   :  { %889 = vmatpush.msrb.mxu2 %v759_v45  ;;  %798 = vmatpush.msrb.mxu1 %v749_v47  ;;  %v715_v45 = vunpack.c.l.bf16 %v2483_v32  ;;  %v650_v47 = vld [vmem:[#allocation2 + $0x18] sm:$0xff] }
 0x2f5   :  { %821 = vmatpush.msrb.mxu0 %v750_v48  ;;  %844 = vmatpush.msra.mxu3 %v751_v51  ;;  %v707_v48 = vunpack.c.l.bf16 %v653_v38  ;;  %v708_v51 = vunpack.c.h.bf16 %v653_v38  ;;  %v702_v60 = vunpack.c.h.bf16 %v650_v47 }
 0x2f6   :  { %890 = vmatpush.msrb.mxu2 %v753_v52  ;;  %799 = vmatpush.msrb.mxu1 %v743_v54  ;;  %v2495_v52 = vld [vmem:[#allocation2 + $0x20] sm:$0xff]  ;;  %v709_v54 = vunpack.c.l.bf16 %v2489_v41 }
 0x2f7   :  { %822 = vmatpush.msrb.mxu0 %v744_v55  ;;  %845 = vmatpush.msra.mxu3 %v745_v58  ;;  %v711_v55 = vunpack.c.l.bf16 %v2491_v44  ;;  %v647_v58 = vld [vmem:[#allocation2] sm:$0xff] }
 0x2f8   :  { %891 = vmatpush.msrb.mxu2 %v747_v59  ;;  %800 = vmatpush.msrb.mxu1 %v737_v61  ;;  %v701_v59 = vunpack.c.l.bf16 %v650_v47  ;;  %v2501_v61 = vld [vmem:[#allocation2 + $0x8] sm:$0xff]  ;;  %v696_v6 = vunpack.c.h.bf16 %v647_v58 }
 0x2f9   :  { %823 = vmatpush.msrb.mxu0 %v738_v62  ;;  %846 = vmatpush.msra.mxu3 %v739_v4  ;;  %v703_v62 = vunpack.c.l.bf16 %v2495_v52  ;;  %v705_v4 = vunpack.c.l.bf16 %v2497_v53  ;;  %v698_v24 = vunpack.c.h.bf16 %v2501_v61 }
 0x2fa   :  { %892 = vmatpush.msrb.mxu2 %v741_v5  ;;  %801 = vmatpush.msrb.mxu1 %v731_v7  ;;  %v695_v5 = vunpack.c.l.bf16 %v647_v58  ;;  %v2505_v7 = vld [vmem:[#allocation2 + $0x10] sm:$0xff] }
 0x2fb   :  { %824 = vmatpush.msrb.mxu0 %v732_v10  ;;  %847 = vmatpush.msra.mxu3 %v733_v13  ;;  %v697_v10 = vunpack.c.l.bf16 %v2501_v61  ;;  %v788_v13 = vunpack.c.h.bf16 %v2413_v2  ;;  %v699_v17 = vunpack.c.l.bf16 %v2505_v7  ;;  %v778_v2 = vunpack.c.h.bf16 %v2429_v21 }
 0x2fc   :  { %893 = vmatpush.msrb.mxu2 %v735_v16  ;;  %802 = vmatpush.msrb.mxu1 %v725_v18  ;;  %v790_v16 = vunpack.c.h.bf16 %v2418_v9  ;;  %v782_v18 = vunpack.c.h.bf16 %v2416_v8  ;;  %v770_v9 = vunpack.c.h.bf16 %v2427_v20  ;;  %v772_v8 = vunpack.c.h.bf16 %v2433_v25 }
 0x2fd   :  { %825 = vmatpush.msrb.mxu0 %v726_v19  ;;  %848 = vmatpush.msra.mxu3 %v727_v22  ;;  %v784_v19 = vunpack.c.h.bf16 %v2424_v15  ;;  %v776_v22 = vunpack.c.h.bf16 %v2422_v14  ;;  %v764_v15 = vunpack.c.h.bf16 %v2435_v28  ;;  %v766_v14 = vunpack.c.h.bf16 %v2437_v29 }
 0x2fe   :  { %894 = vmatpush.msrb.mxu2 %v729_v26  ;;  %803 = vmatpush.msrb.mxu1 %v719_v30  ;;  %v758_v21 = vunpack.c.h.bf16 %v2441_v35  ;;  %v760_v20 = vunpack.c.h.bf16 %v2443_v36  ;;  %v752_v26 = vunpack.c.h.bf16 %v2447_v42  ;;  %v754_v25 = vunpack.c.h.bf16 %v2449_v43 }
 0x2ff   :  { %826 = vmatpush.msrb.mxu0 %v720_v31  ;;  %849 = vmatpush.msra.mxu3 %v721_v34  ;;  %v746_v28 = vunpack.c.h.bf16 %v2453_v49  ;;  %v748_v29 = vunpack.c.h.bf16 %v2455_v50  ;;  %v740_v35 = vunpack.c.h.bf16 %v2459_v56  ;;  %v742_v36 = vunpack.c.h.bf16 %v2461_v57 }
 0x300   :  { %895 = vmatpush.msrb.mxu2 %v723_v37  ;;  %804 = vmatpush.msrb.mxu1 %v713_v39  ;;  %v734_v42 = vunpack.c.h.bf16 %v2465_v1  ;;  %v736_v43 = vunpack.c.h.bf16 %v2467_v3  ;;  %v728_v49 = vunpack.c.h.bf16 %v2471_v11  ;;  %v730_v50 = vunpack.c.h.bf16 %v2473_v12 }
 0x301   :  { %827 = vmatpush.msrb.mxu0 %v714_v40  ;;  %850 = vmatpush.msra.mxu3 %v715_v45  ;;  %v722_v56 = vunpack.c.h.bf16 %v2477_v23  ;;  %v716_v57 = vunpack.c.h.bf16 %v2483_v32  ;;  %v718_v1 = vunpack.c.h.bf16 %v2485_v33  ;;  %v710_v3 = vunpack.c.h.bf16 %v2489_v41  ;;  %v791_v40 = vld [vmem:[%s2607_s6] sm:$0x3] }
 0x302   :  { %896 = vmatpush.msrb.mxu2 %v717_v46  ;;  %805 = vmatpush.msrb.mxu1 %v707_v48  ;;  %v712_v11 = vunpack.c.h.bf16 %v2491_v44  ;;  %v704_v12 = vunpack.c.h.bf16 %v2495_v52  ;;  %v706_v23 = vunpack.c.h.bf16 %v2497_v53  ;;  %v700_v30 = vunpack.c.h.bf16 %v2505_v7  ;;  %v997_v7 = vld [vmem:[#allocation14] sm:$0x3] }
 0x303   :  { %828 = vmatpush.msrb.mxu0 %v708_v51  ;;  %851 = vmatpush.msra.mxu3 %v709_v54  ;;  %v967_v48 = vperm.slane %v791_v40, 0 }
 0x304   :  { %897 = vmatpush.msrb.mxu2 %v711_v55  ;;  %806 = vmatpush.msrb.mxu1 %v701_v59 }
 0x305   :  { %829 = vmatpush.msrb.mxu0 %v702_v60  ;;  %852 = vmatpush.msra.mxu3 %v703_v62 }
 0x306   :  { %898 = vmatpush.msrb.mxu2 %v705_v4  ;;  %807 = vmatpush.msrb.mxu1 %v695_v5 }
 0x307   :  { %830 = vmatpush.msrb.mxu0 %v696_v6  ;;  %853 = vmatpush.msra.mxu3 %v697_v10  ;;  %v1050_v10 = vld [vmem:[#allocation14 + $0x2] sm:$0x3] }
 0x308   :  { %861 = vmatpush.msra.mxu1 %v788_v13  ;;  %854 = vmatmul.f32.vlgmr.msra.gmra.mxu3 %v2409_v63 }
 0x309   :  { %907 = vmatpush.msra.mxu0 %v790_v16  ;;  %899 = vmatpush.msrb.mxu2 %v699_v17 }
 0x30a   :  { %862 = vmatpush.msra.mxu1 %v782_v18  ;;  %900 = vmatmul.f32.vlgmr.msrb.gmra.mxu2 %v2409_v63 }
 0x30b   :  { %908 = vmatpush.msra.mxu0 %v784_v19  ;;  %808 = vmatmul.f32.vlgmr.msrb.gmra.mxu1 %v2409_v63 }
 0x30c   :  { %863 = vmatpush.msra.mxu1 %v776_v22  ;;  %831 = vmatmul.f32.vlgmr.msrb.gmra.mxu0 %v2409_v63 }
 0x30d   :  { %909 = vmatpush.msra.mxu0 %v778_v2 }
 0x30e   :  { %864 = vmatpush.msra.mxu1 %v770_v9 }
 0x30f   :  { %910 = vmatpush.msra.mxu0 %v772_v8 }
 0x310   :  { %865 = vmatpush.msra.mxu1 %v764_v15  ;;  %857 = vmatmul.f32.gmra.mxu3 %v2411_v0 }
 0x311   :  { %911 = vmatpush.msra.mxu0 %v766_v14  ;;  %v968_v14 = vperm.slane %v791_v40, 1 }
 0x312   :  { %866 = vmatpush.msra.mxu1 %v758_v21  ;;  %903 = vmatmul.f32.gmra.mxu2 %v2411_v0 }
 0x313   :  { %912 = vmatpush.msra.mxu0 %v760_v20  ;;  %811 = vmatmul.f32.gmra.mxu1 %v2411_v0 }
 0x314   :  { %867 = vmatpush.msra.mxu1 %v752_v26  ;;  %834 = vmatmul.f32.gmra.mxu0 %v2411_v0 }
 0x315   :  { %913 = vmatpush.msra.mxu0 %v754_v25 }
 0x316   :  { %868 = vmatpush.msra.mxu1 %v746_v28 }
 0x317   :  { %914 = vmatpush.msra.mxu0 %v748_v29 }
 0x318   :  { %869 = vmatpush.msra.mxu1 %v740_v35 }
 0x319   :  { %915 = vmatpush.msra.mxu0 %v742_v36 }
 0x31a   :  { %870 = vmatpush.msra.mxu1 %v734_v42 }
 0x31b   :  { %916 = vmatpush.msra.mxu0 %v736_v43 }
 0x31c   :  { %871 = vmatpush.msra.mxu1 %v728_v49 }
 0x31d   :  { %917 = vmatpush.msra.mxu0 %v730_v50 }
 0x31e   :  { %872 = vmatpush.msra.mxu1 %v722_v56 }
 0x31f   :  { %918 = vmatpush.msra.mxu0 %v724_v27  ;;  %v1095_v27 = vld [vmem:[#allocation14 + $0x4] sm:$0x3] }
 0x320   :  { %873 = vmatpush.msra.mxu1 %v716_v57 }
 0x321   :  { %919 = vmatpush.msra.mxu0 %v718_v1 }
 0x322   :  { %874 = vmatpush.msra.mxu1 %v710_v3 }
 0x323   :  { %920 = vmatpush.msra.mxu0 %v712_v11 }
 0x324   :  { %875 = vmatpush.msra.mxu1 %v704_v12 }
 0x325   :  { %921 = vmatpush.msra.mxu0 %v706_v23 }
 0x326   :  { %876 = vmatpush.msra.mxu1 %v698_v24 }
 0x327   :  { %922 = vmatpush.msra.mxu0 %v700_v30  ;;  %877 = vmatmul.f32.vlgmr.msra.gmra.mxu1 %v2409_v63 }
 0x328   :  { %923 = vmatmul.f32.vlgmr.msra.gmra.mxu0 %v2409_v63 }
 0x32f   :  { %880 = vmatmul.f32.gmra.mxu1 %v2411_v0 }
 0x330   :  { %926 = vmatmul.f32.gmra.mxu0 %v2411_v0 }
 0x388   :  { %v809_v31 = vpop.f32.mrf.mxu1 }
 0x389   :  { %v832_v34 = vpop.f32.mrf.mxu0 }
 0x38b   :  { %v855_v32 = vpop.f32.mrf.mxu3 }
 0x38c   :  { %v934_v37 = vrot.slane %v855_v32, 1 }
 0x38d   :  { %v901_v33 = vpop.f32.mrf.mxu2 }
 0x38e   :  { %v952_v41 = vrot.slane %v901_v33, 2 }
 0x390   :  { %v812_v39 = vpop.f32.mrf.mxu1 }
 0x391   :  { %v835_v55 = vpop.f32.mrf.mxu0 }
 0x393   :  { %v858_v38 = vpop.f32.mrf.mxu3 }
 0x394   :  { %v935_v44 = vrot.slane %v858_v38, 1 }
 0x395   :  { %v904_v45 = vpop.f32.mrf.mxu2 }
 0x396   :  { %v936_v63 = vsel %vm277_vm2, %v934_v37, %v935_v44  ;;  %v946_v46 = vadd.f32 %v935_v44, %v812_v39  ;;  %v953_v47 = vrot.slane %v904_v45, 2 }
 0x397   :  { %v944_v0 = vadd.f32 %v936_v63, %v809_v31 }
 0x398   :  { %v954_v51 = vsel %vm551_vm6, %v952_v41, %v953_v47  ;;  %v964_v52 = vadd.f32 %v953_v47, %v946_v46 }
 0x399   :  { %v962_v53 = vadd.f32 %v954_v51, %v944_v0 }
 0x39a   :  { %v973_v54 = vadd.f32 %v967_v48, %v964_v52 }
 0x39b   :  { %v971_v58 = vadd.f32 %v967_v48, %v962_v53 }
 0x39c   :  { %v977_v59 = vmax.f32 %v973_v54, 0.0 }
 0x39d   :  { %v975_v60 = vmax.f32 %v971_v58, 0.0 }
 0x39e   :  { %v984_v61 = vrot.slane %v977_v59, 1 }
 0x39f   :  { %v983_v62 = vrot.slane %v975_v60, 1 }
 0x3a0   :  { %v995_v4 = vmax.f32 %v977_v59, %v984_v61 }
 0x3a1   :  { %v985_v5 = vsel %vm277_vm2, %v983_v62, %v984_v61 }
 0x3a2   :  { %1594 = vmatpush.msk.msrb.mxu3 %vm1002_vm8, %v995_v4  ;;  %1598 = vmatpush.msk.msra.mxu2 %vm1002_vm8, %v995_v4  ;;  %v993_v6 = vmax.f32 %v975_v60, %v985_v5 }
 0x3a4   :  { %v878_v13 = vpop.f32.mrf.mxu1  ;;  %1024 = vmatpush.msrb.mxu3 %v993_v6  ;;  %1069 = vmatpush.msra.mxu2 %v993_v6 }
 0x3a5   :  { %v924_v16 = vpop.f32.mrf.mxu0  ;;  %1595 = vmatmul.msk.f32.vlgmr.msrb.gmra.mxu3 %vm998_vm9, %v997_v7  ;;  %1599 = vmatmul.msk.f32.vlgmr.msra.gmra.mxu2 %vm998_vm9, %v1050_v10  ;;  %v937_v18 = vrot.slane %v878_v13, 1 }
 0x3a6   :  { %v955_v9 = vrot.slane %v924_v16, 2 }
 0x3ac   :  { %v881_v17 = vpop.f32.mrf.mxu1 }
 0x3ad   :  { %v938_v19 = vrot.slane %v881_v17, 1  ;;  %v927_v22 = vpop.f32.mrf.mxu0 }
 0x3ae   :  { %v956_v2 = vrot.slane %v927_v22, 2 }
 0x3af   :  { %v939_v8 = vsel %vm277_vm2, %v937_v18, %v938_v19  ;;  %v947_v15 = vadd.f32 %v938_v19, %v835_v55 }
 0x3b0   :  { %v945_v21 = vadd.f32 %v939_v8, %v832_v34  ;;  %v957_v20 = vsel %vm551_vm6, %v955_v9, %v956_v2 }
 0x3b1   :  { %v965_v26 = vadd.f32 %v956_v2, %v947_v15 }
 0x3b2   :  { %v963_v25 = vadd.f32 %v957_v20, %v945_v21 }
 0x3b3   :  { %v974_v28 = vadd.f32 %v968_v14, %v965_v26 }
 0x3b4   :  { %v972_v29 = vadd.f32 %v968_v14, %v963_v25 }
 0x3b5   :  { %v978_v35 = vmax.f32 %v974_v28, 0.0 }
 0x3b6   :  { %v976_v36 = vmax.f32 %v972_v29, 0.0 }
 0x3b7   :  { %v987_v42 = vrot.slane %v978_v35, 1 }
 0x3b8   :  { %v986_v43 = vrot.slane %v976_v36, 1 }
 0x3b9   :  { %v996_v49 = vmax.f32 %v978_v35, %v987_v42 }
 0x3ba   :  { %v988_v50 = vsel %vm277_vm2, %v986_v43, %v987_v42 }
 0x3bb   :  { %1596 = vmatpush.msk.msrb.mxu1 %vm1002_vm8, %v996_v49  ;;  %1600 = vmatpush.msk.msra.mxu3 %vm1002_vm8, %v996_v49  ;;  %v994_v56 = vmax.f32 %v976_v36, %v988_v50 }
 0x3bc   :  { %1604 = vmatpush.msk.msrb.mxu2 %vm1002_vm8, %v996_v49 }
 0x3bd   :  { %1044 = vmatpush.msrb.mxu1 %v994_v56  ;;  %1089 = vmatpush.msra.mxu3 %v994_v56 }
 0x3be   :  { %1134 = vmatpush.msrb.mxu2 %v994_v56  ;;  %1597 = vmatmul.msk.f32.vlgmr.msrb.gmra.mxu1 %vm998_vm9, %v997_v7 }
 0x3bf   :  { %1602 = vmatpush.msk.msra.mxu1 %vm1002_vm8, %v995_v4  ;;  %1601 = vmatmul.msk.f32.vlgmr.msra.gmra.mxu3 %vm998_vm9, %v1050_v10 }
 0x3c0   :  { %1605 = vmatmul.msk.f32.vlgmr.msrb.gmra.mxu2 %vm998_vm9, %v1095_v27 }
 0x3c1   :  { %1114 = vmatpush.msra.mxu1 %v993_v6 }
 0x3c6   :  { %1603 = vmatmul.msk.f32.vlgmr.msra.gmra.mxu1 %vm998_vm9, %v1095_v27 }
 0x428   :  { %v2574_v57 = vpop.f32.mrf.mxu3  ;;  %v2576_v1 = vpop.f32.mrf.mxu2 }
 0x43b   :  { %v2578_v3 = vpop.f32.mrf.mxu1 }
 0x442   :  { %v2580_v11 = vpop.f32.mrf.mxu3 }
 0x443   :  { %v2582_v12 = vpop.f32.mrf.mxu2  ;;  %v2584_v23 = vpop.f32.mrf.mxu1 }
 0x444   :  { %2138 = dma.done.wait [#allocation5 + $0x1], 6144 }
 0x445   :  { %2139 = vsyncadd [#allocation5 + $0x1], 4294961152  ;;  %v1839_v24 = vld [vmem:[#allocation3 + $0x38] sm:$0xff]   ;;  %v1838_v30 = vld [vmem:[#allocation3 + $0x30] sm:$0xff]  }
 0x446   :  { %v1640_v31 = vunpack.c.h.bf16 %v1839_v24  ;;  %v1639_v32 = vunpack.c.l.bf16 %v1839_v24  ;;  %v1847_v33 = vld [vmem:[#allocation3 + $0x78] sm:$0xff]   ;;  %v1846_v34 = vld [vmem:[#allocation3 + $0x70] sm:$0xff]   ;;  %v1636_v39 = vunpack.c.h.bf16 %v1838_v30  ;;  %v1837_v40 = vld [vmem:[#allocation3 + $0x28] sm:$0xff]   ;;  %v1635_v45 = vunpack.c.l.bf16 %v1838_v30 }
 0x447   :  { %v1672_v37 = vunpack.c.h.bf16 %v1847_v33  ;;  %v1671_v38 = vunpack.c.l.bf16 %v1847_v33  ;;  %v1668_v41 = vunpack.c.h.bf16 %v1846_v34  ;;  %v1863_v44 = vld [vmem:[#allocation3 + $0xf8] sm:$0xff]   ;;  %v1845_v63 = vld [vmem:[#allocation3 + $0x68] sm:$0xff]   ;;  %v1667_v46 = vunpack.c.l.bf16 %v1846_v34  ;;  %v1862_v48 = vld [vmem:[#allocation3 + $0xf0] sm:$0xff]  }
 0x448   :  { %1339 = vmatpush.msrb.mxu3 %v1640_v31  ;;  %v1855_v47 = vld [vmem:[#allocation3 + $0xb8] sm:$0xff]   ;;  %v1632_v0 = vunpack.c.h.bf16 %v1837_v40  ;;  %v1736_v51 = vunpack.c.h.bf16 %v1863_v44  ;;  %v1836_v52 = vld [vmem:[#allocation3 + $0x20] sm:$0xff]   ;;  %v1664_v53 = vunpack.c.h.bf16 %v1845_v63  ;;  %v1735_v54 = vunpack.c.l.bf16 %v1863_v44  ;;  %v1854_v61 = vld [vmem:[#allocation3 + $0xb0] sm:$0xff]  }
 0x449   :  { %1359 = vmatpush.msrb.mxu0 %v1672_v37  ;;  %v1631_v55 = vunpack.c.l.bf16 %v1837_v40  ;;  %v1844_v58 = vld [vmem:[#allocation3 + $0x60] sm:$0xff]   ;;  %v1704_v59 = vunpack.c.h.bf16 %v1855_v47  ;;  %v1732_v60 = vunpack.c.h.bf16 %v1862_v48  ;;  %v1663_v62 = vunpack.c.l.bf16 %v1845_v63  ;;  %v1861_v5 = vld [vmem:[#allocation3 + $0xe8] sm:$0xff]   ;;  %v1835_v10 = vld [vmem:[#allocation3 + $0x18] sm:$0xff]  }
 0x44a   :  { %1340 = vmatpush.msrb.mxu3 %v1639_v32  ;;  %1399 = vmatpush.msra.mxu2 %v1736_v51  ;;  %v1703_v4 = vunpack.c.l.bf16 %v1855_v47  ;;  %v1628_v6 = vunpack.c.h.bf16 %v1836_v52  ;;  %v1731_v7 = vunpack.c.l.bf16 %v1862_v48  ;;  %v1660_v13 = vunpack.c.h.bf16 %v1844_v58  ;;  %v1843_v18 = vld [vmem:[#allocation3 + $0x58] sm:$0xff]   ;;  %v1853_v22 = vld [vmem:[#allocation3 + $0xa8] sm:$0xff]   ;;  %v1860_v8 = vld [vmem:[#allocation3 + $0xe0] sm:$0xff]  }
 0x44b   :  { %1360 = vmatpush.msrb.mxu0 %v1671_v38  ;;  %1379 = vmatpush.msrb.mxu1 %v1704_v59  ;;  %v1700_v16 = vunpack.c.h.bf16 %v1854_v61  ;;  %v1627_v17 = vunpack.c.l.bf16 %v1836_v52  ;;  %v1728_v19 = vunpack.c.h.bf16 %v1861_v5  ;;  %v1659_v2 = vunpack.c.l.bf16 %v1844_v58  ;;  %v1834_v21 = vld [vmem:[#allocation3 + $0x10] sm:$0xff]   ;;  %v1852_v35 = vld [vmem:[#allocation3 + $0xa0] sm:$0xff]   ;;  %v1859_v43 = vld [vmem:[#allocation3 + $0xd8] sm:$0xff]  }
 0x44c   :  { %1341 = vmatpush.msrb.mxu3 %v1636_v39  ;;  %1400 = vmatpush.msra.mxu2 %v1735_v54  ;;  %v1699_v9 = vunpack.c.l.bf16 %v1854_v61  ;;  %v1624_v15 = vunpack.c.h.bf16 %v1835_v10  ;;  %v1727_v14 = vunpack.c.l.bf16 %v1861_v5  ;;  %v1656_v20 = vunpack.c.h.bf16 %v1843_v18  ;;  %v1842_v28 = vld [vmem:[#allocation3 + $0x50] sm:$0xff]   ;;  %v1833_v56 = vld [vmem:[#allocation3 + $0x8] sm:$0xff]   ;;  %v1851_v33 = vld [vmem:[#allocation3 + $0x98] sm:$0xff]  }
 0x44d   :  { %1361 = vmatpush.msrb.mxu0 %v1668_v41  ;;  %1380 = vmatpush.msrb.mxu1 %v1703_v4  ;;  %v1696_v26 = vunpack.c.h.bf16 %v1853_v22  ;;  %v1623_v25 = vunpack.c.l.bf16 %v1835_v10  ;;  %v1724_v29 = vunpack.c.h.bf16 %v1860_v8  ;;  %v1655_v36 = vunpack.c.l.bf16 %v1843_v18  ;;  %v1841_v31 = vld [vmem:[#allocation3 + $0x48] sm:$0xff]   ;;  %v1858_v38 = vld [vmem:[#allocation3 + $0xd0] sm:$0xff]   ;;  %v1610_v41 = vld [vmem:[#allocation3] sm:$0xff]  }
 0x44e   :  { %1342 = vmatpush.msrb.mxu3 %v1635_v45  ;;  %1401 = vmatpush.msra.mxu2 %v1732_v60  ;;  %v1695_v42 = vunpack.c.l.bf16 %v1853_v22  ;;  %v1620_v49 = vunpack.c.h.bf16 %v1834_v21  ;;  %v1723_v50 = vunpack.c.l.bf16 %v1860_v8  ;;  %v1652_v27 = vunpack.c.h.bf16 %v1842_v28  ;;  %v1850_v48 = vld [vmem:[#allocation3 + $0x90] sm:$0xff]   ;;  %v1857_v52 = vld [vmem:[#allocation3 + $0xc8] sm:$0xff]   ;;  %v1871_v54 = vld [vmem:[#allocation3 + $0x138] sm:$0xff]  }
 0x44f   :  { %1362 = vmatpush.msrb.mxu0 %v1667_v46  ;;  %1381 = vmatpush.msrb.mxu1 %v1700_v16  ;;  %v1692_v24 = vunpack.c.h.bf16 %v1852_v35  ;;  %v1619_v30 = vunpack.c.l.bf16 %v1834_v21  ;;  %v1720_v32 = vunpack.c.h.bf16 %v1859_v43  ;;  %v1651_v34 = vunpack.c.l.bf16 %v1842_v28  ;;  %v1840_v46 = vld [vmem:[#allocation3 + $0x40] sm:$0xff]   ;;  %v1879_v59 = vld [vmem:[#allocation3 + $0x178] sm:$0xff]   ;;  %v1849_v10 = vld [vmem:[#allocation3 + $0x88] sm:$0xff]  }
 0x450   :  { %1343 = vmatpush.msrb.mxu3 %v1632_v0  ;;  %1402 = vmatpush.msra.mxu2 %v1731_v7  ;;  %v1691_v37 = vunpack.c.l.bf16 %v1852_v35  ;;  %v1616_v39 = vunpack.c.h.bf16 %v1833_v56  ;;  %v1719_v40 = vunpack.c.l.bf16 %v1859_v43  ;;  %v1648_v44 = vunpack.c.h.bf16 %v1841_v31  ;;  %v1878_v16 = vld [vmem:[#allocation3 + $0x170] sm:$0xff]   ;;  %v1856_v18 = vld [vmem:[#allocation3 + $0xc0] sm:$0xff]   ;;  %v1869_v8 = vld [vmem:[#allocation3 + $0x128] sm:$0xff]  }
 0x451   :  { %1363 = vmatpush.msrb.mxu0 %v1664_v53  ;;  %1382 = vmatpush.msrb.mxu1 %v1699_v9  ;;  %v1688_v45 = vunpack.c.h.bf16 %v1851_v33  ;;  %v1615_v63 = vunpack.c.l.bf16 %v1833_v56  ;;  %v1716_v47 = vunpack.c.h.bf16 %v1858_v38  ;;  %v1647_v0 = vunpack.c.l.bf16 %v1841_v31 }
 0x452   :  { %1344 = vmatpush.msrb.mxu3 %v1631_v55  ;;  %1403 = vmatpush.msra.mxu2 %v1728_v19  ;;  %v1687_v51 = vunpack.c.l.bf16 %v1851_v33  ;;  %v1612_v53 = vunpack.c.h.bf16 %v1610_v41  ;;  %v1715_v55 = vunpack.c.l.bf16 %v1858_v38  ;;  %v1644_v58 = vunpack.c.h.bf16 %v1840_v46 }
 0x453   :  { %1364 = vmatpush.msrb.mxu0 %v1663_v62  ;;  %1383 = vmatpush.msrb.mxu1 %v1696_v26  ;;  %v1684_v60 = vunpack.c.h.bf16 %v1850_v48  ;;  %v1611_v61 = vunpack.c.l.bf16 %v1610_v41  ;;  %v1712_v62 = vunpack.c.h.bf16 %v1857_v52  ;;  %v1768_v4 = vunpack.c.h.bf16 %v1871_v54 }
 0x454   :  { %1345 = vmatpush.msrb.mxu3 %v1628_v6  ;;  %1404 = vmatpush.msra.mxu2 %v1727_v14  ;;  %v1643_v5 = vunpack.c.l.bf16 %v1840_v46  ;;  %v1870_v6 = vld [vmem:[#allocation3 + $0x130] sm:$0xff]   ;;  %v1800_v7 = vunpack.c.h.bf16 %v1879_v59  ;;  %v1799_v19 = vunpack.c.l.bf16 %v1879_v59  ;;  %v1711_v22 = vunpack.c.l.bf16 %v1857_v52  ;;  %v1912_v59 = vld [vmem:[%s2612_s11] ss:$0 sm:$0xff] }
 0x455   :  { %1365 = vmatpush.msrb.mxu0 %v1660_v13  ;;  %1384 = vmatpush.msrb.mxu1 %v1695_v42  ;;  %v1767_v13 = vunpack.c.l.bf16 %v1871_v54  ;;  %v1680_v9 = vunpack.c.h.bf16 %v1849_v10  ;;  %v1708_v14 = vunpack.c.h.bf16 %v1856_v18  ;;  %v1763_v21 = vunpack.c.l.bf16 %v1870_v6 }
 0x456   :  { %1346 = vmatpush.msrb.mxu3 %v1627_v17  ;;  %1405 = vmatpush.msra.mxu2 %v1724_v29  ;;  %v1683_v17 = vunpack.c.l.bf16 %v1850_v48  ;;  %v1679_v26 = vunpack.c.l.bf16 %v1849_v10  ;;  %v1795_v28 = vunpack.c.l.bf16 %v1878_v16  ;;  %v1707_v29 = vunpack.c.l.bf16 %v1856_v18 }
 0x457   :  { %1366 = vmatpush.msrb.mxu0 %v1659_v2  ;;  %1385 = vmatpush.msrb.mxu1 %v1692_v24  ;;  %v1764_v2 = vunpack.c.h.bf16 %v1870_v6  ;;  %v1760_v35 = vunpack.c.h.bf16 %v1869_v8  ;;  %v1867_v24 = vld [vmem:[#allocation3 + $0x118] sm:$0xff]  }
 0x458   :  { %1347 = vmatpush.msrb.mxu3 %v1624_v15  ;;  %1406 = vmatpush.msra.mxu2 %v1723_v50  ;;  %v1796_v15 = vunpack.c.h.bf16 %v1878_v16 }
 0x459   :  { %1367 = vmatpush.msrb.mxu0 %v1656_v20  ;;  %1386 = vmatpush.msrb.mxu1 %v1691_v37  ;;  %v1877_v20 = vld [vmem:[#allocation3 + $0x168] sm:$0xff]   ;;  %v1866_v37 = vld [vmem:[#allocation3 + $0x110] sm:$0xff]  }
 0x45a   :  { %1348 = vmatpush.msrb.mxu3 %v1623_v25  ;;  %1407 = vmatpush.msra.mxu2 %v1720_v32  ;;  %v1848_v25 = vld [vmem:[#allocation3 + $0x80] sm:$0xff]   ;;  %v1792_v42 = vunpack.c.h.bf16 %v1877_v20  ;;  %v1791_v50 = vunpack.c.l.bf16 %v1877_v20  ;;  %v1875_v32 = vld [vmem:[#allocation3 + $0x158] sm:$0xff]   ;;  %v1748_v41 = vunpack.c.h.bf16 %v1866_v37 }
 0x45b   :  { %1368 = vmatpush.msrb.mxu0 %v1655_v36  ;;  %1387 = vmatpush.msrb.mxu1 %v1688_v45  ;;  %v1868_v36 = vld [vmem:[#allocation3 + $0x120] sm:$0xff]   ;;  %v1676_v43 = vunpack.c.h.bf16 %v1848_v25  ;;  %v1675_v56 = vunpack.c.l.bf16 %v1848_v25  ;;  %v1784_v38 = vunpack.c.h.bf16 %v1875_v32  ;;  %v1747_v45 = vunpack.c.l.bf16 %v1866_v37 }
 0x45c   :  { %1349 = vmatpush.msrb.mxu3 %v1620_v49  ;;  %1408 = vmatpush.msra.mxu2 %v1719_v40  ;;  %v1876_v49 = vld [vmem:[#allocation3 + $0x160] sm:$0xff]   ;;  %v1755_v31 = vunpack.c.l.bf16 %v1868_v36  ;;  %v1783_v40 = vunpack.c.l.bf16 %v1875_v32 }
 0x45d   :  { %1369 = vmatpush.msrb.mxu0 %v1652_v27  ;;  %1388 = vmatpush.msrb.mxu1 %v1687_v51  ;;  %v1756_v27 = vunpack.c.h.bf16 %v1868_v36  ;;  %v1787_v33 = vunpack.c.l.bf16 %v1876_v49  ;;  %v1872_v51 = vld [vmem:[#allocation3 + $0x140] sm:$0xff]  }
 0x45e   :  { %1350 = vmatpush.msrb.mxu3 %v1619_v30  ;;  %1409 = vmatpush.msra.mxu2 %v1716_v47  ;;  %v1788_v30 = vunpack.c.h.bf16 %v1876_v49  ;;  %v1864_v47 = vld [vmem:[#allocation3 + $0x100] sm:$0xff]   ;;  %v1772_v54 = vunpack.c.h.bf16 %v1872_v51 }
 0x45f   :  { %1370 = vmatpush.msrb.mxu0 %v1651_v34  ;;  %1389 = vmatpush.msrb.mxu1 %v1684_v60  ;;  %v1752_v34 = vunpack.c.h.bf16 %v1867_v24 }
 0x460   :  { %1351 = vmatpush.msrb.mxu3 %v1616_v39  ;;  %1410 = vmatpush.msra.mxu2 %v1715_v55  ;;  %v1874_v39 = vld [vmem:[#allocation3 + $0x150] sm:$0xff]   ;;  %v1739_v55 = vunpack.c.l.bf16 %v1864_v47 }
 0x461   :  { %1371 = vmatpush.msrb.mxu0 %v1648_v44  ;;  %1390 = vmatpush.msrb.mxu1 %v1683_v17  ;;  %v1865_v44 = vld [vmem:[#allocation3 + $0x108] sm:$0xff]   ;;  %v1779_v46 = vunpack.c.l.bf16 %v1874_v39 }
 0x462   :  { %1352 = vmatpush.msrb.mxu3 %v1615_v63  ;;  %1411 = vmatpush.msra.mxu2 %v1712_v62  ;;  %v1873_v63 = vld [vmem:[#allocation3 + $0x148] sm:$0xff]  }
 0x463   :  { %1372 = vmatpush.msrb.mxu0 %v1647_v0  ;;  %1391 = vmatpush.msrb.mxu1 %v1680_v9  ;;  %v1776_v48 = vunpack.c.h.bf16 %v1873_v63  ;;  %v1743_v0 = vunpack.c.l.bf16 %v1865_v44  ;;  %v1775_v52 = vunpack.c.l.bf16 %v1873_v63 }
 0x464   :  { %1353 = vmatpush.msrb.mxu3 %v1612_v53  ;;  %1412 = vmatpush.msra.mxu2 %v1711_v22  ;;  %v1740_v53 = vunpack.c.h.bf16 %v1864_v47 }
 0x465   :  { %1373 = vmatpush.msrb.mxu0 %v1644_v58  ;;  %1392 = vmatpush.msrb.mxu1 %v1679_v26  ;;  %v1771_v58 = vunpack.c.l.bf16 %v1872_v51 }
 0x466   :  { %1354 = vmatpush.msrb.mxu3 %v1611_v61  ;;  %1413 = vmatpush.msra.mxu2 %v1708_v14 }
 0x467   :  { %1374 = vmatpush.msrb.mxu0 %v1643_v5  ;;  %1355 = vmatmul.f32.vlgmr.msrb.gmra.mxu3 %v2574_v57  ;;  %v1759_v57 = vunpack.c.l.bf16 %v1869_v8 }
 0x468   :  { %1419 = vmatpush.msra.mxu3 %v1768_v4  ;;  %1414 = vmatpush.msra.mxu2 %v1707_v29 }
 0x469   :  { %1439 = vmatpush.msra.mxu0 %v1800_v7  ;;  %1415 = vmatmul.f32.vlgmr.msra.gmra.mxu2 %v2580_v11  ;;  %v1751_v11 = vunpack.c.l.bf16 %v1867_v24 }
 0x46a   :  { %1420 = vmatpush.msra.mxu3 %v1767_v13  ;;  %1393 = vmatpush.msrb.mxu1 %v1676_v43 }
 0x46b   :  { %1440 = vmatpush.msra.mxu0 %v1799_v19 }
 0x46c   :  { %1421 = vmatpush.msra.mxu3 %v1764_v2  ;;  %1375 = vmatmul.f32.vlgmr.msrb.gmra.mxu0 %v2578_v3  ;;  %v1780_v3 = vunpack.c.h.bf16 %v1874_v39 }
 0x46d   :  { %1441 = vmatpush.msra.mxu0 %v1796_v15  ;;  %1394 = vmatpush.msrb.mxu1 %v1675_v56 }
 0x46e   :  { %1422 = vmatpush.msra.mxu3 %v1763_v21  ;;  %1395 = vmatmul.f32.vlgmr.msrb.gmra.mxu1 %v2576_v1  ;;  %v1744_v1 = vunpack.c.h.bf16 %v1865_v44 }
 0x46f   :  { %1442 = vmatpush.msra.mxu0 %v1795_v28 }
 0x470   :  { %1423 = vmatpush.msra.mxu3 %v1760_v35 }
 0x471   :  { %1443 = vmatpush.msra.mxu0 %v1792_v42 }
 0x472   :  { %1424 = vmatpush.msra.mxu3 %v1759_v57 }
 0x473   :  { %1444 = vmatpush.msra.mxu0 %v1791_v50 }
 0x474   :  { %1425 = vmatpush.msra.mxu3 %v1756_v27 }
 0x475   :  { %1445 = vmatpush.msra.mxu0 %v1788_v30 }
 0x476   :  { %1426 = vmatpush.msra.mxu3 %v1755_v31 }
 0x477   :  { %1446 = vmatpush.msra.mxu0 %v1787_v33 }
 0x478   :  { %1427 = vmatpush.msra.mxu3 %v1752_v34 }
 0x479   :  { %1447 = vmatpush.msra.mxu0 %v1784_v38 }
 0x47a   :  { %1428 = vmatpush.msra.mxu3 %v1751_v11 }
 0x47b   :  { %1448 = vmatpush.msra.mxu0 %v1783_v40 }
 0x47c   :  { %1429 = vmatpush.msra.mxu3 %v1748_v41 }
 0x47d   :  { %1449 = vmatpush.msra.mxu0 %v1780_v3 }
 0x47e   :  { %1430 = vmatpush.msra.mxu3 %v1747_v45 }
 0x47f   :  { %1450 = vmatpush.msra.mxu0 %v1779_v46 }
 0x480   :  { %1431 = vmatpush.msra.mxu3 %v1744_v1 }
 0x481   :  { %1451 = vmatpush.msra.mxu0 %v1776_v48 }
 0x482   :  { %1432 = vmatpush.msra.mxu3 %v1743_v0 }
 0x483   :  { %1452 = vmatpush.msra.mxu0 %v1775_v52 }
 0x484   :  { %1433 = vmatpush.msra.mxu3 %v1740_v53 }
 0x485   :  { %1453 = vmatpush.msra.mxu0 %v1772_v54 }
 0x486   :  { %1434 = vmatpush.msra.mxu3 %v1739_v55 }
 0x487   :  { %1435 = vmatmul.f32.vlgmr.msra.gmra.mxu3 %v2584_v23  ;;  %1454 = vmatpush.msra.mxu0 %v1771_v58 }
 0x488   :  { %1455 = vmatmul.f32.vlgmr.msra.gmra.mxu0 %v2582_v12 }
 0x4e9   :  { %v1376_v62 = vpop.f32.mrf.mxu0 }
 0x4ea   :  { %v1356_v60 = vpop.f32.mrf.mxu3 }
 0x4eb   :  { %v1357_v61 = vadd.f32 %v1912_v59, %v1356_v60  ;;  %v1396_v5 = vpop.f32.mrf.mxu1 }
 0x4ec   :  { %v1416_v7 = vpop.f32.mrf.mxu2 }
 0x4ed   :  { %v1377_v4 = vadd.f32 %v1376_v62, %v1357_v61 }
 0x4ef   :  { %v1397_v6 = vadd.f32 %v1396_v5, %v1377_v4 }
 0x4f1   :  { %v1417_v10 = vadd.f32 %v1416_v7, %v1397_v6 }
 0x505   :  { %v1456_v16 = vpop.f32.mrf.mxu0 }
 0x50a   :  { %v1436_v13 = vpop.f32.mrf.mxu3 }
 0x50b   :  { %v1437_v17 = vadd.f32 %v1436_v13, %v1417_v10 }
 0x50d   :  { %v1457_v18 = vadd.f32 %v1456_v16, %v1437_v17 }
 0x50f   :  { %v1459_v23 = vmax.f32 %v1457_v18, 0.0 }
 0x510   :  { %2140 = dma.done.wait [#allocation5 + $0x2], 1024 }
 0x511   :  { %2141 = vsyncadd [#allocation5 + $0x2], 4294966272  ;;  %v1886_v12 = vld [vmem:[#allocation4 + $0x38] sm:$0xff]   ;;  %v1885_v19 = vld [vmem:[#allocation4 + $0x30] sm:$0xff]   ;;  %s2156_s25 = smov [#allocation15]   ;;  %s1527_s3 = sshll.u32 %s2615_s14, 4  ;;  %s1528_s3 = int_to_ptr.hbm [resolvable:$true] %s1527_s3 }
 0x512   :  { %v1832_v22 = vunpack.c.h.bf16 %v1886_v12  ;;  %v1831_v2 = vunpack.c.l.bf16 %v1886_v12  ;;  %v1828_v9 = vunpack.c.h.bf16 %v1885_v19  ;;  %v1884_v8 = vld [vmem:[#allocation4 + $0x28] sm:$0xff]   ;;  %v1827_v15 = vunpack.c.l.bf16 %v1885_v19  ;;  %v1883_v21 = vld [vmem:[#allocation4 + $0x20] sm:$0xff]   ;;  %v1882_v25 = vld [vmem:[#allocation4 + $0x18] sm:$0xff]   ;;  %s1525_s26 = sshll.u32 %s2156_s25, 4  ;;  %s1526_s26 = int_to_ptr.vmem [resolvable:$true] %s1525_s26 }
 0x513   :  { %v1824_v14 = vunpack.c.h.bf16 %v1884_v8  ;;  %v1823_v20 = vunpack.c.l.bf16 %v1884_v8  ;;  %v1820_v26 = vunpack.c.h.bf16 %v1883_v21  ;;  %v1819_v28 = vunpack.c.l.bf16 %v1883_v21  ;;  %v1881_v35 = vld [vmem:[#allocation4 + $0x10] sm:$0xff]   ;;  %v1880_v43 = vld [vmem:[#allocation4 + $0x8] sm:$0xff]   ;;  %v1802_v50 = vld [vmem:[#allocation4] sm:$0xff]  }
 0x514   :  { %1499 = vmatpush.msra.mxu1 %v1832_v22  ;;  %v1816_v29 = vunpack.c.h.bf16 %v1882_v25  ;;  %v1815_v36 = vunpack.c.l.bf16 %v1882_v25  ;;  %v1812_v42 = vunpack.c.h.bf16 %v1881_v35  ;;  %v1811_v57 = vunpack.c.l.bf16 %v1881_v35  ;;  %v1913_v30 = vld [vmem:[%s2614_s13] ss:$0 sm:$0xff] }
 0x515   :  { %v1808_v49 = vunpack.c.h.bf16 %v1880_v43  ;;  %v1807_v56 = vunpack.c.l.bf16 %v1880_v43  ;;  %v1804_v27 = vunpack.c.h.bf16 %v1802_v50  ;;  %v1803_v24 = vunpack.c.l.bf16 %v1802_v50 }
 0x516   :  { %1500 = vmatpush.msra.mxu1 %v1831_v2 }
 0x518   :  { %1501 = vmatpush.msra.mxu1 %v1828_v9 }
 0x51a   :  { %1502 = vmatpush.msra.mxu1 %v1827_v15 }
 0x51c   :  { %1503 = vmatpush.msra.mxu1 %v1824_v14 }
 0x51e   :  { %1504 = vmatpush.msra.mxu1 %v1823_v20 }
 0x520   :  { %1505 = vmatpush.msra.mxu1 %v1820_v26 }
 0x522   :  { %1506 = vmatpush.msra.mxu1 %v1819_v28 }
 0x524   :  { %1507 = vmatpush.msra.mxu1 %v1816_v29 }
 0x526   :  { %1508 = vmatpush.msra.mxu1 %v1815_v36 }
 0x528   :  { %1509 = vmatpush.msra.mxu1 %v1812_v42 }
 0x52a   :  { %1510 = vmatpush.msra.mxu1 %v1811_v57 }
 0x52c   :  { %1511 = vmatpush.msra.mxu1 %v1808_v49 }
 0x52e   :  { %1512 = vmatpush.msra.mxu1 %v1807_v56 }
 0x530   :  { %1513 = vmatpush.msra.mxu1 %v1804_v27 }
 0x532   :  { %1514 = vmatpush.msra.mxu1 %v1803_v24 }
 0x533   :  { %1515 = vmatmul.f32.vlgmr.msra.gmra.mxu1 %v1459_v23 }
 0x5b0   :  { %v1516_v31 = vpop.f32.mrf.mxu1 }
 0x5b1   :  { %v1517_v32 = vadd.f32 %v1913_v30, %v1516_v31 }
 0x5b3   :  { %1519 = vst [vmem:[#allocation15] sm:$0x3] %v1517_v32 }
 0x5b4   :  { %1530 = dma.vmem_to_hbm [thread:$0]  %s1526_s26, 32, %s1528_s3, [#allocation8]  }
 0x5b5   :  { %2142 = dma.done.wait [#allocation8], 32  }
 0x5b6   :  { %2143 = vsyncadd [#allocation8], 4294967264 }
 0x5b7   :  { %1535 = vsyncpa [#allocation7], 1 }
 0x5b8   :  { %1536 = vsyncpa [#allocation10], 1 }
 0x5b9   :  { %1537 = vsyncpa [#allocation13], 1 }
 0x5ba   :  { %1538 = vsyncpa [#allocation8], 1 }
 0x5bb   :  { %1539 = vsyncmov [#allocation5] }
 0x5be   :  { %s1540_s13 = vpop.sfrf %1539 }
 0x5bf   :  { %p1606_p0 = scmp.ne.s32.totalorder %s1540_s13, 0 }
 0x5c1   :  { %1544 = shalt.err (%p1606_p0)  }
 0x5c2   :  { %1546 = vsyncmov [#allocation5 + $0x1] }
 0x5c5   :  { %s1547_s28 = vpop.sfrf %1546 }
 0x5c6   :  { %p1607_p1 = scmp.ne.s32.totalorder %s1547_s28, 0 }
 0x5c8   :  { %1551 = shalt.err (%p1607_p1)  }
 0x5c9   :  { %1553 = vsyncmov [#allocation5 + $0x2] }
 0x5cc   :  { %s1554_s14 = vpop.sfrf %1553 }
 0x5cd   :  { %p1608_p2 = scmp.ne.s32.totalorder %s1554_s14, 0 }
 0x5cf   :  { %1558 = shalt.err (%p1608_p2)  }

</bundles_post_ra>
